<compile_context>
chip_gen: v7x
topology: tpu7x:2x2x1
jax: 0.10.0
libtpu: 0.0.40
codegen_flags: <defaults>
</compile_context>

<pallas_src>
import jax
import jax.numpy as jnp
from jax.experimental import pallas as pl
from jax.experimental.pallas import tpu as pltpu

# ---------------- small synthetic BERT config ----------------
VOCAB = 100
B = 2          # batch
S = 8          # sequence length
H = 32         # hidden size (== config.bert_fc)
N_HEADS = 2
D_HEAD = H // N_HEADS
FFN = 64       # intermediate size
N_LAYERS = 2
NC0 = 3        # config.num_classes0
NC1 = 5        # config.num_classes1
LN_EPS = 1e-12

_VMEM = pl.BlockSpec(memory_space=pltpu.MemorySpace.VMEM)


def _layernorm(x, g, b):
    mu = jnp.mean(x, axis=-1, keepdims=True)
    var = jnp.mean((x - mu) ** 2, axis=-1, keepdims=True)
    return (x - mu) * jax.lax.rsqrt(var + LN_EPS) * g + b


def _softmax_last(x):
    m = jnp.max(x, axis=-1, keepdims=True)
    e = jnp.exp(x - m)
    return e / jnp.sum(e, axis=-1, keepdims=True)


# ---------------- single fused kernel ----------------
def mybert_fused_kernel(
        tok_ref, wemb_ref, pemb_ref, temb_ref, eg_ref, eb_ref,
        wqkv_ref, bqkv_ref, wo_ref, bo_ref, ln1g_ref, ln1b_ref,
        wi_ref, bi_ref, wo2_ref, bo2_ref, ln2g_ref, ln2b_ref,
        wp_ref, bp_ref, w0_ref, b0_ref, w1_ref, b1_ref,
        out0_ref, out1_ref):
    f32 = jnp.float32
    bf16 = jnp.bfloat16

    # ---- embeddings: one-hot MXU "gather" + position + token-type, then LN ----
    tok = tok_ref[...]                                             # (B, S, 1) int32
    vocab_ids = jax.lax.broadcasted_iota(jnp.int32, (B, S, VOCAB), 2)
    onehot = (vocab_ids == tok).astype(f32)                        # (B, S, VOCAB)
    word = jnp.einsum('bsv,vh->bsh', onehot, wemb_ref[...],
                      preferred_element_type=f32)                  # (B, S, H)
    x = word + pemb_ref[...] + temb_ref[...]
    x = _layernorm(x, eg_ref[...], eb_ref[...])

    scale = 1.0 / float(D_HEAD) ** 0.5

    for l in range(N_LAYERS):
        # hoist this layer's parameters into locals (loaded once per layer)
        wqkv, bqkv = wqkv_ref[l], bqkv_ref[l]
        wo, bo = wo_ref[l], bo_ref[l]
        g1, b1 = ln1g_ref[l], ln1b_ref[l]
        wi, bi = wi_ref[l], bi_ref[l]
        wo2, bo2 = wo2_ref[l], bo2_ref[l]
        g2, b2 = ln2g_ref[l], ln2b_ref[l]

        # fused QKV: one (B*S, H) x (H, 3H) matmul, bf16 operands, f32 accum
        qkv = jnp.einsum('bsh,hd->bsd', x.astype(bf16), wqkv,
                         preferred_element_type=f32) + bqkv        # (B, S, 3H)
        q = qkv[:, :, 0 * H:1 * H]
        k = qkv[:, :, 1 * H:2 * H]
        v = qkv[:, :, 2 * H:3 * H]

        # move heads onto the leading (batch) axis -> one batched einsum each
        qh = jnp.concatenate(
            [q[:, :, h * D_HEAD:(h + 1) * D_HEAD] for h in range(N_HEADS)], axis=0)
        kh = jnp.concatenate(
            [k[:, :, h * D_HEAD:(h + 1) * D_HEAD] for h in range(N_HEADS)], axis=0)
        vh = jnp.concatenate(
            [v[:, :, h * D_HEAD:(h + 1) * D_HEAD] for h in range(N_HEADS)], axis=0)

        scores = jnp.einsum('bqd,bkd->bqk', qh, kh,
                            preferred_element_type=f32) * scale    # (NH*B, S, S)
        p = _softmax_last(scores)
        ctxh = jnp.einsum('bqk,bkd->bqd', p, vh,
                          preferred_element_type=f32)              # (NH*B, S, Dh)
        ctx = jnp.concatenate(
            [ctxh[h * B:(h + 1) * B] for h in range(N_HEADS)], axis=-1)  # (B, S, H)

        attn_out = jnp.einsum('bsh,hd->bsd', ctx.astype(bf16), wo,
                              preferred_element_type=f32) + bo
        x1 = _layernorm(attn_out + x, g1, b1)

        hid = jnp.einsum('bsh,hf->bsf', x1.astype(bf16), wi,
                         preferred_element_type=f32) + bi
        # TODO(synk): exact erf-GELU of HF BERT replaced by tanh approximation.
        hid = jax.nn.gelu(hid, approximate=True)
        ffn_out = jnp.einsum('bsf,fh->bsh', hid.astype(bf16), wo2,
                             preferred_element_type=f32) + bo2
        x = _layernorm(ffn_out + x1, g2, b2)

    # ---- pooler (tanh of [CLS]) + dropout(eval=identity) + heads + softmax ----
    x0 = x[:, 0:1, :]                                              # (B, 1, H)
    pooled = jnp.tanh(jnp.einsum('bsh,hd->bsd', x0.astype(bf16), wp_ref[...],
                                 preferred_element_type=f32) + bp_ref[...])
    pooled_bf = pooled.astype(bf16)
    logits0 = jnp.einsum('bsh,hc->bsc', pooled_bf, w0_ref[...],
                         preferred_element_type=f32) + b0_ref[...]
    logits1 = jnp.einsum('bsh,hc->bsc', pooled_bf, w1_ref[...],
                         preferred_element_type=f32) + b1_ref[...]
    out0_ref[...] = _softmax_last(logits0)                         # (B, 1, NC0)
    out1_ref[...] = _softmax_last(logits1)                         # (B, 1, NC1)


# ---------------- parameter init (deterministic, synthetic) ----------------
ARG_ORDER = [
    "word_emb", "pos_emb", "type_emb", "emb_ln_g", "emb_ln_b",
    "wqkv", "bqkv", "wo", "bo", "ln1_g", "ln1_b",
    "wi", "bi", "wo2", "bo2", "ln2_g", "ln2_b",
    "wp", "bp", "w_fc0", "b_fc0", "w_fc1", "b_fc1",
]


def init_params(key):
    ks = iter(jax.random.split(key, 64))
    f32, bf16 = jnp.float32, jnp.bfloat16

    def nrm(shape, dtype=f32, scale=0.02):
        return (scale * jax.random.normal(next(ks), shape, dtype=f32)).astype(dtype)

    return {
        # embeddings (kept f32: one-hot gather matmul stays exact)
        "word_emb": nrm((VOCAB, H)),
        "pos_emb": nrm((1, S, H)),
        "type_emb": nrm((1, 1, H)),
        "emb_ln_g": jnp.ones((1, H), f32),
        "emb_ln_b": jnp.zeros((1, H), f32),
        # stacked per-layer weights; matmul weights in bf16, rest f32
        "wqkv": nrm((N_LAYERS, H, 3 * H), bf16),
        "bqkv": jnp.zeros((N_LAYERS, 1, 3 * H), f32),
        "wo":   nrm((N_LAYERS, H, H), bf16),
        "bo":   jnp.zeros((N_LAYERS, 1, H), f32),
        "ln1_g": jnp.ones((N_LAYERS, 1, H), f32),
        "ln1_b": jnp.zeros((N_LAYERS, 1, H), f32),
        "wi":   nrm((N_LAYERS, H, FFN), bf16),
        "bi":   jnp.zeros((N_LAYERS, 1, FFN), f32),
        "wo2":  nrm((N_LAYERS, FFN, H), bf16),
        "bo2":  jnp.zeros((N_LAYERS, 1, H), f32),
        "ln2_g": jnp.ones((N_LAYERS, 1, H), f32),
        "ln2_b": jnp.zeros((N_LAYERS, 1, H), f32),
        # pooler + classification heads
        "wp": nrm((H, H), bf16),
        "bp": jnp.zeros((1, H), f32),
        "w_fc0": nrm((H, NC0), bf16),
        "b_fc0": jnp.zeros((1, NC0), f32),
        "w_fc1": nrm((H, NC1), bf16),
        "b_fc1": jnp.zeros((1, NC1), f32),
    }


# ---------------- full forward (Mybert.forward equivalent) ----------------
@jax.jit
def mybert_forward(tokens, params):
    tok3 = tokens.reshape(B, S, 1).astype(jnp.int32)
    args = [tok3] + [params[k] for k in ARG_ORDER]
    out0, out1 = pl.pallas_call(
        mybert_fused_kernel,
        out_shape=(jax.ShapeDtypeStruct((B, 1, NC0), jnp.float32),
                   jax.ShapeDtypeStruct((B, 1, NC1), jnp.float32)),
        in_specs=[_VMEM] * len(args),
        out_specs=(_VMEM, _VMEM),
    )(*args)
    return out0[:, 0, :], out1[:, 0, :]


if __name__ == "__main__":
    key = jax.random.PRNGKey(0)
    pkey, tkey = jax.random.split(key)
    params = init_params(pkey)
    tokens = jax.random.randint(tkey, (B, S), 0, VOCAB, dtype=jnp.int32)

    logits0, logits1 = mybert_forward(tokens, params)
    jax.block_until_ready((logits0, logits1))

    assert logits0.shape == (B, NC0) and logits1.shape == (B, NC1)
    # Each softmax output row sums to ~1.
    assert jnp.allclose(jnp.sum(logits0, axis=1), 1.0, atol=1e-5)
    assert jnp.allclose(jnp.sum(logits1, axis=1), 1.0, atol=1e-5)
    print("KERNEL_OK")
</pallas_src>

<mosaic_0001>
module attributes {stable_mosaic.version = 11 : i64} {
  func.func @mybert_fused_kernel(%arg0: memref<2x8x1xi32, #tpu.memory_space<vmem>>, %arg1: memref<100x32xf32, #tpu.memory_space<vmem>>, %arg2: memref<1x8x32xf32, #tpu.memory_space<vmem>>, %arg3: memref<1x1x32xf32, #tpu.memory_space<vmem>>, %arg4: memref<1x32xf32, #tpu.memory_space<vmem>>, %arg5: memref<1x32xf32, #tpu.memory_space<vmem>>, %arg6: memref<2x32x96xbf16, #tpu.memory_space<vmem>>, %arg7: memref<2x1x96xf32, #tpu.memory_space<vmem>>, %arg8: memref<2x32x32xbf16, #tpu.memory_space<vmem>>, %arg9: memref<2x1x32xf32, #tpu.memory_space<vmem>>, %arg10: memref<2x1x32xf32, #tpu.memory_space<vmem>>, %arg11: memref<2x1x32xf32, #tpu.memory_space<vmem>>, %arg12: memref<2x32x64xbf16, #tpu.memory_space<vmem>>, %arg13: memref<2x1x64xf32, #tpu.memory_space<vmem>>, %arg14: memref<2x64x32xbf16, #tpu.memory_space<vmem>>, %arg15: memref<2x1x32xf32, #tpu.memory_space<vmem>>, %arg16: memref<2x1x32xf32, #tpu.memory_space<vmem>>, %arg17: memref<2x1x32xf32, #tpu.memory_space<vmem>>, %arg18: memref<32x32xbf16, #tpu.memory_space<vmem>>, %arg19: memref<1x32xf32, #tpu.memory_space<vmem>>, %arg20: memref<32x3xbf16, #tpu.memory_space<vmem>>, %arg21: memref<1x3xf32, #tpu.memory_space<vmem>>, %arg22: memref<32x5xbf16, #tpu.memory_space<vmem>>, %arg23: memref<1x5xf32, #tpu.memory_space<vmem>>, %arg24: memref<2x1x3xf32, #tpu.memory_space<vmem>>, %arg25: memref<2x1x5xf32, #tpu.memory_space<vmem>>) attributes {dimension_semantics = [], scalar_prefetch = 0 : i64, scratch_operands = 0 : i64, tpu.core_type = #tpu.core_type<tc>} {
    %c0 = arith.constant 0 : index
    %c0_0 = arith.constant 0 : index
    %c0_1 = arith.constant 0 : index
    %0 = vector.load %arg0[%c0, %c0_0, %c0_1] : memref<2x8x1xi32, #tpu.memory_space<vmem>>, vector<2x8x1xi32>
    %1 = tpu.iota {dimensions = array<i32: 2>} : vector<2x8x100xi32>
    %2 = vector.broadcast %0 : vector<2x8x1xi32> to vector<2x8x100xi32>
    %3 = arith.cmpi eq, %1, %2 : vector<2x8x100xi32>
    %4 = arith.extui %3 : vector<2x8x100xi1> to vector<2x8x100xi32>
    %5 = arith.sitofp %4 : vector<2x8x100xi32> to vector<2x8x100xf32>
    %c0_2 = arith.constant 0 : index
    %c0_3 = arith.constant 0 : index
    %6 = vector.load %arg1[%c0_2, %c0_3] : memref<100x32xf32, #tpu.memory_space<vmem>>, vector<100x32xf32>
    "tpu.trace_start"() <{level = 10 : i32, message = "bsv,vh->bsh"}> : () -> ()
    %cst = arith.constant dense<0.000000e+00> : vector<2x8x32xf32>
    %7 = tpu.matmul %5, %6, %cst {dimension_numbers = #tpu.dot_dimension_numbers<[2], [0], [0, 1], [1], [0, 0, 0, 1, 1, 1], [], []>} : vector<2x8x100xf32>, vector<100x32xf32>, vector<2x8x32xf32> -> vector<2x8x32xf32>
    "tpu.trace_stop"() : () -> ()
    %c0_4 = arith.constant 0 : index
    %c0_5 = arith.constant 0 : index
    %c0_6 = arith.constant 0 : index
    %8 = vector.load %arg2[%c0_4, %c0_5, %c0_6] : memref<1x8x32xf32, #tpu.memory_space<vmem>>, vector<1x8x32xf32>
    %9 = vector.broadcast %8 : vector<1x8x32xf32> to vector<2x8x32xf32>
    %10 = arith.addf %7, %9 : vector<2x8x32xf32>
    %c0_7 = arith.constant 0 : index
    %c0_8 = arith.constant 0 : index
    %c0_9 = arith.constant 0 : index
    %11 = vector.load %arg3[%c0_7, %c0_8, %c0_9] : memref<1x1x32xf32, #tpu.memory_space<vmem>>, vector<1x1x32xf32>
    %12 = vector.broadcast %11 : vector<1x1x32xf32> to vector<2x8x32xf32>
    %13 = arith.addf %10, %12 : vector<2x8x32xf32>
    %c0_10 = arith.constant 0 : index
    %c0_11 = arith.constant 0 : index
    %14 = vector.load %arg4[%c0_10, %c0_11] : memref<1x32xf32, #tpu.memory_space<vmem>>, vector<1x32xf32>
    %c0_12 = arith.constant 0 : index
    %c0_13 = arith.constant 0 : index
    %15 = vector.load %arg5[%c0_12, %c0_13] : memref<1x32xf32, #tpu.memory_space<vmem>>, vector<1x32xf32>
    %cst_14 = arith.constant dense<0.000000e+00> : vector<2x8xf32>
    %16 = vector.multi_reduction <add>, %13, %cst_14 [2] : vector<2x8x32xf32> to vector<2x8xf32>
    %17 = vector.shape_cast %16 : vector<2x8xf32> to vector<2x8x1xf32>
    %cst_15 = arith.constant 3.200000e+01 : f32
    %18 = vector.broadcast %cst_15 : f32 to vector<2x8x1xf32>
    %19 = arith.divf %17, %18 : vector<2x8x1xf32>
    %20 = vector.broadcast %19 : vector<2x8x1xf32> to vector<2x8x32xf32>
    %21 = arith.subf %13, %20 : vector<2x8x32xf32>
    %22 = arith.mulf %21, %21 : vector<2x8x32xf32>
    %cst_16 = arith.constant dense<0.000000e+00> : vector<2x8xf32>
    %23 = vector.multi_reduction <add>, %22, %cst_16 [2] : vector<2x8x32xf32> to vector<2x8xf32>
    %24 = vector.shape_cast %23 : vector<2x8xf32> to vector<2x8x1xf32>
    %cst_17 = arith.constant 3.200000e+01 : f32
    %25 = vector.broadcast %cst_17 : f32 to vector<2x8x1xf32>
    %26 = arith.divf %24, %25 : vector<2x8x1xf32>
    %27 = vector.broadcast %19 : vector<2x8x1xf32> to vector<2x8x32xf32>
    %28 = arith.subf %13, %27 : vector<2x8x32xf32>
    %cst_18 = arith.constant 9.99999996E-13 : f32
    %29 = vector.broadcast %cst_18 : f32 to vector<2x8x1xf32>
    %30 = arith.addf %26, %29 : vector<2x8x1xf32>
    %31 = math.rsqrt %30 : vector<2x8x1xf32>
    %32 = vector.broadcast %31 : vector<2x8x1xf32> to vector<2x8x32xf32>
    %33 = arith.mulf %28, %32 : vector<2x8x32xf32>
    %34 = vector.shape_cast %14 : vector<1x32xf32> to vector<1x1x32xf32>
    %35 = vector.broadcast %34 : vector<1x1x32xf32> to vector<2x8x32xf32>
    %36 = arith.mulf %33, %35 : vector<2x8x32xf32>
    %37 = vector.shape_cast %15 : vector<1x32xf32> to vector<1x1x32xf32>
    %38 = vector.broadcast %37 : vector<1x1x32xf32> to vector<2x8x32xf32>
    %39 = arith.addf %36, %38 : vector<2x8x32xf32>
    %c0_19 = arith.constant 0 : index
    %c0_20 = arith.constant 0 : index
    %c0_21 = arith.constant 0 : index
    %40 = vector.load %arg6[%c0_19, %c0_20, %c0_21] : memref<2x32x96xbf16, #tpu.memory_space<vmem>>, vector<1x32x96xbf16>
    %41 = vector.shape_cast %40 : vector<1x32x96xbf16> to vector<32x96xbf16>
    %c0_22 = arith.constant 0 : index
    %c0_23 = arith.constant 0 : index
    %c0_24 = arith.constant 0 : index
    %42 = vector.load %arg7[%c0_22, %c0_23, %c0_24] : memref<2x1x96xf32, #tpu.memory_space<vmem>>, vector<1x1x96xf32>
    %43 = vector.shape_cast %42 : vector<1x1x96xf32> to vector<1x96xf32>
    %c0_25 = arith.constant 0 : index
    %c0_26 = arith.constant 0 : index
    %c0_27 = arith.constant 0 : index
    %44 = vector.load %arg8[%c0_25, %c0_26, %c0_27] : memref<2x32x32xbf16, #tpu.memory_space<vmem>>, vector<1x32x32xbf16>
    %45 = vector.shape_cast %44 : vector<1x32x32xbf16> to vector<32x32xbf16>
    %c0_28 = arith.constant 0 : index
    %c0_29 = arith.constant 0 : index
    %c0_30 = arith.constant 0 : index
    %46 = vector.load %arg9[%c0_28, %c0_29, %c0_30] : memref<2x1x32xf32, #tpu.memory_space<vmem>>, vector<1x1x32xf32>
    %47 = vector.shape_cast %46 : vector<1x1x32xf32> to vector<1x32xf32>
    %c0_31 = arith.constant 0 : index
    %c0_32 = arith.constant 0 : index
    %c0_33 = arith.constant 0 : index
    %48 = vector.load %arg10[%c0_31, %c0_32, %c0_33] : memref<2x1x32xf32, #tpu.memory_space<vmem>>, vector<1x1x32xf32>
    %49 = vector.shape_cast %48 : vector<1x1x32xf32> to vector<1x32xf32>
    %c0_34 = arith.constant 0 : index
    %c0_35 = arith.constant 0 : index
    %c0_36 = arith.constant 0 : index
    %50 = vector.load %arg11[%c0_34, %c0_35, %c0_36] : memref<2x1x32xf32, #tpu.memory_space<vmem>>, vector<1x1x32xf32>
    %51 = vector.shape_cast %50 : vector<1x1x32xf32> to vector<1x32xf32>
    %c0_37 = arith.constant 0 : index
    %c0_38 = arith.constant 0 : index
    %c0_39 = arith.constant 0 : index
    %52 = vector.load %arg12[%c0_37, %c0_38, %c0_39] : memref<2x32x64xbf16, #tpu.memory_space<vmem>>, vector<1x32x64xbf16>
    %53 = vector.shape_cast %52 : vector<1x32x64xbf16> to vector<32x64xbf16>
    %c0_40 = arith.constant 0 : index
    %c0_41 = arith.constant 0 : index
    %c0_42 = arith.constant 0 : index
    %54 = vector.load %arg13[%c0_40, %c0_41, %c0_42] : memref<2x1x64xf32, #tpu.memory_space<vmem>>, vector<1x1x64xf32>
    %55 = vector.shape_cast %54 : vector<1x1x64xf32> to vector<1x64xf32>
    %c0_43 = arith.constant 0 : index
    %c0_44 = arith.constant 0 : index
    %c0_45 = arith.constant 0 : index
    %56 = vector.load %arg14[%c0_43, %c0_44, %c0_45] : memref<2x64x32xbf16, #tpu.memory_space<vmem>>, vector<1x64x32xbf16>
    %57 = vector.shape_cast %56 : vector<1x64x32xbf16> to vector<64x32xbf16>
    %c0_46 = arith.constant 0 : index
    %c0_47 = arith.constant 0 : index
    %c0_48 = arith.constant 0 : index
    %58 = vector.load %arg15[%c0_46, %c0_47, %c0_48] : memref<2x1x32xf32, #tpu.memory_space<vmem>>, vector<1x1x32xf32>
    %59 = vector.shape_cast %58 : vector<1x1x32xf32> to vector<1x32xf32>
    %c0_49 = arith.constant 0 : index
    %c0_50 = arith.constant 0 : index
    %c0_51 = arith.constant 0 : index
    %60 = vector.load %arg16[%c0_49, %c0_50, %c0_51] : memref<2x1x32xf32, #tpu.memory_space<vmem>>, vector<1x1x32xf32>
    %61 = vector.shape_cast %60 : vector<1x1x32xf32> to vector<1x32xf32>
    %c0_52 = arith.constant 0 : index
    %c0_53 = arith.constant 0 : index
    %c0_54 = arith.constant 0 : index
    %62 = vector.load %arg17[%c0_52, %c0_53, %c0_54] : memref<2x1x32xf32, #tpu.memory_space<vmem>>, vector<1x1x32xf32>
    %63 = vector.shape_cast %62 : vector<1x1x32xf32> to vector<1x32xf32>
    %64 = arith.truncf %39 : vector<2x8x32xf32> to vector<2x8x32xbf16>
    "tpu.trace_start"() <{level = 10 : i32, message = "bsh,hd->bsd"}> : () -> ()
    %cst_55 = arith.constant dense<0.000000e+00> : vector<2x8x96xf32>
    %65 = tpu.matmul %64, %41, %cst_55 {dimension_numbers = #tpu.dot_dimension_numbers<[2], [0], [0, 1], [1], [0, 0, 0, 1, 1, 1], [], []>} : vector<2x8x32xbf16>, vector<32x96xbf16>, vector<2x8x96xf32> -> vector<2x8x96xf32>
    "tpu.trace_stop"() : () -> ()
    %66 = vector.shape_cast %43 : vector<1x96xf32> to vector<1x1x96xf32>
    %67 = vector.broadcast %66 : vector<1x1x96xf32> to vector<2x8x96xf32>
    %68 = arith.addf %65, %67 : vector<2x8x96xf32>
    %69 = vector.extract_strided_slice %68 {offsets = [0, 0, 0], sizes = [2, 8, 32], strides = [1, 1, 1]} : vector<2x8x96xf32> to vector<2x8x32xf32>
    %70 = vector.extract_strided_slice %68 {offsets = [0, 0, 32], sizes = [2, 8, 32], strides = [1, 1, 1]} : vector<2x8x96xf32> to vector<2x8x32xf32>
    %71 = vector.extract_strided_slice %68 {offsets = [0, 0, 64], sizes = [2, 8, 32], strides = [1, 1, 1]} : vector<2x8x96xf32> to vector<2x8x32xf32>
    %72 = vector.extract_strided_slice %69 {offsets = [0, 0, 0], sizes = [2, 8, 16], strides = [1, 1, 1]} : vector<2x8x32xf32> to vector<2x8x16xf32>
    %73 = vector.extract_strided_slice %69 {offsets = [0, 0, 16], sizes = [2, 8, 16], strides = [1, 1, 1]} : vector<2x8x32xf32> to vector<2x8x16xf32>
    %74 = tpu.concatenate %72, %73 in 0 : vector<2x8x16xf32>, vector<2x8x16xf32> -> vector<4x8x16xf32>
    %75 = vector.extract_strided_slice %70 {offsets = [0, 0, 0], sizes = [2, 8, 16], strides = [1, 1, 1]} : vector<2x8x32xf32> to vector<2x8x16xf32>
    %76 = vector.extract_strided_slice %70 {offsets = [0, 0, 16], sizes = [2, 8, 16], strides = [1, 1, 1]} : vector<2x8x32xf32> to vector<2x8x16xf32>
    %77 = tpu.concatenate %75, %76 in 0 : vector<2x8x16xf32>, vector<2x8x16xf32> -> vector<4x8x16xf32>
    %78 = vector.extract_strided_slice %71 {offsets = [0, 0, 0], sizes = [2, 8, 16], strides = [1, 1, 1]} : vector<2x8x32xf32> to vector<2x8x16xf32>
    %79 = vector.extract_strided_slice %71 {offsets = [0, 0, 16], sizes = [2, 8, 16], strides = [1, 1, 1]} : vector<2x8x32xf32> to vector<2x8x16xf32>
    %80 = tpu.concatenate %78, %79 in 0 : vector<2x8x16xf32>, vector<2x8x16xf32> -> vector<4x8x16xf32>
    "tpu.trace_start"() <{level = 10 : i32, message = "bqd,bkd->bqk"}> : () -> ()
    %cst_56 = arith.constant dense<0.000000e+00> : vector<4x8x8xf32>
    %81 = tpu.matmul %74, %77, %cst_56 {dimension_numbers = #tpu.dot_dimension_numbers<[2], [2], [1], [1], [0, 0, 0, 1, 1, 1], [0], [0]>} : vector<4x8x16xf32>, vector<4x8x16xf32>, vector<4x8x8xf32> -> vector<4x8x8xf32>
    "tpu.trace_stop"() : () -> ()
    %cst_57 = arith.constant 2.500000e-01 : f32
    %82 = vector.broadcast %cst_57 : f32 to vector<4x8x8xf32>
    %83 = arith.mulf %81, %82 : vector<4x8x8xf32>
    %cst_58 = arith.constant dense<0xFF800000> : vector<4x8xf32>
    %84 = vector.multi_reduction <maximumf>, %83, %cst_58 [2] : vector<4x8x8xf32> to vector<4x8xf32>
    %85 = vector.shape_cast %84 : vector<4x8xf32> to vector<4x8x1xf32>
    %86 = vector.broadcast %85 : vector<4x8x1xf32> to vector<4x8x8xf32>
    %87 = arith.subf %83, %86 : vector<4x8x8xf32>
    %88 = math.exp %87 : vector<4x8x8xf32>
    %cst_59 = arith.constant dense<0.000000e+00> : vector<4x8xf32>
    %89 = vector.multi_reduction <add>, %88, %cst_59 [2] : vector<4x8x8xf32> to vector<4x8xf32>
    %90 = vector.shape_cast %89 : vector<4x8xf32> to vector<4x8x1xf32>
    %91 = vector.broadcast %90 : vector<4x8x1xf32> to vector<4x8x8xf32>
    %92 = arith.divf %88, %91 : vector<4x8x8xf32>
    "tpu.trace_start"() <{level = 10 : i32, message = "bqk,bkd->bqd"}> : () -> ()
    %cst_60 = arith.constant dense<0.000000e+00> : vector<4x8x16xf32>
    %93 = tpu.matmul %92, %80, %cst_60 {dimension_numbers = #tpu.dot_dimension_numbers<[2], [1], [1], [2], [0, 0, 0, 1, 1, 2], [0], [0]>} : vector<4x8x8xf32>, vector<4x8x16xf32>, vector<4x8x16xf32> -> vector<4x8x16xf32>
    "tpu.trace_stop"() : () -> ()
    %94 = vector.extract_strided_slice %93 {offsets = [0, 0, 0], sizes = [2, 8, 16], strides = [1, 1, 1]} : vector<4x8x16xf32> to vector<2x8x16xf32>
    %95 = vector.extract_strided_slice %93 {offsets = [2, 0, 0], sizes = [2, 8, 16], strides = [1, 1, 1]} : vector<4x8x16xf32> to vector<2x8x16xf32>
    %96 = tpu.concatenate %94, %95 in 2 : vector<2x8x16xf32>, vector<2x8x16xf32> -> vector<2x8x32xf32>
    %97 = arith.truncf %96 : vector<2x8x32xf32> to vector<2x8x32xbf16>
    "tpu.trace_start"() <{level = 10 : i32, message = "bsh,hd->bsd"}> : () -> ()
    %cst_61 = arith.constant dense<0.000000e+00> : vector<2x8x32xf32>
    %98 = tpu.matmul %97, %45, %cst_61 {dimension_numbers = #tpu.dot_dimension_numbers<[2], [0], [0, 1], [1], [0, 0, 0, 1, 1, 1], [], []>} : vector<2x8x32xbf16>, vector<32x32xbf16>, vector<2x8x32xf32> -> vector<2x8x32xf32>
    "tpu.trace_stop"() : () -> ()
    %99 = vector.shape_cast %47 : vector<1x32xf32> to vector<1x1x32xf32>
    %100 = vector.broadcast %99 : vector<1x1x32xf32> to vector<2x8x32xf32>
    %101 = arith.addf %98, %100 : vector<2x8x32xf32>
    %102 = arith.addf %101, %39 : vector<2x8x32xf32>
    %cst_62 = arith.constant dense<0.000000e+00> : vector<2x8xf32>
    %103 = vector.multi_reduction <add>, %102, %cst_62 [2] : vector<2x8x32xf32> to vector<2x8xf32>
    %104 = vector.shape_cast %103 : vector<2x8xf32> to vector<2x8x1xf32>
    %cst_63 = arith.constant 3.200000e+01 : f32
    %105 = vector.broadcast %cst_63 : f32 to vector<2x8x1xf32>
    %106 = arith.divf %104, %105 : vector<2x8x1xf32>
    %107 = vector.broadcast %106 : vector<2x8x1xf32> to vector<2x8x32xf32>
    %108 = arith.subf %102, %107 : vector<2x8x32xf32>
    %109 = arith.mulf %108, %108 : vector<2x8x32xf32>
    %cst_64 = arith.constant dense<0.000000e+00> : vector<2x8xf32>
    %110 = vector.multi_reduction <add>, %109, %cst_64 [2] : vector<2x8x32xf32> to vector<2x8xf32>
    %111 = vector.shape_cast %110 : vector<2x8xf32> to vector<2x8x1xf32>
    %cst_65 = arith.constant 3.200000e+01 : f32
    %112 = vector.broadcast %cst_65 : f32 to vector<2x8x1xf32>
    %113 = arith.divf %111, %112 : vector<2x8x1xf32>
    %114 = vector.broadcast %106 : vector<2x8x1xf32> to vector<2x8x32xf32>
    %115 = arith.subf %102, %114 : vector<2x8x32xf32>
    %cst_66 = arith.constant 9.99999996E-13 : f32
    %116 = vector.broadcast %cst_66 : f32 to vector<2x8x1xf32>
    %117 = arith.addf %113, %116 : vector<2x8x1xf32>
    %118 = math.rsqrt %117 : vector<2x8x1xf32>
    %119 = vector.broadcast %118 : vector<2x8x1xf32> to vector<2x8x32xf32>
    %120 = arith.mulf %115, %119 : vector<2x8x32xf32>
    %121 = vector.shape_cast %49 : vector<1x32xf32> to vector<1x1x32xf32>
    %122 = vector.broadcast %121 : vector<1x1x32xf32> to vector<2x8x32xf32>
    %123 = arith.mulf %120, %122 : vector<2x8x32xf32>
    %124 = vector.shape_cast %51 : vector<1x32xf32> to vector<1x1x32xf32>
    %125 = vector.broadcast %124 : vector<1x1x32xf32> to vector<2x8x32xf32>
    %126 = arith.addf %123, %125 : vector<2x8x32xf32>
    %127 = arith.truncf %126 : vector<2x8x32xf32> to vector<2x8x32xbf16>
    "tpu.trace_start"() <{level = 10 : i32, message = "bsh,hf->bsf"}> : () -> ()
    %cst_67 = arith.constant dense<0.000000e+00> : vector<2x8x64xf32>
    %128 = tpu.matmul %127, %53, %cst_67 {dimension_numbers = #tpu.dot_dimension_numbers<[2], [0], [0, 1], [1], [0, 0, 0, 1, 1, 1], [], []>} : vector<2x8x32xbf16>, vector<32x64xbf16>, vector<2x8x64xf32> -> vector<2x8x64xf32>
    "tpu.trace_stop"() : () -> ()
    %129 = vector.shape_cast %55 : vector<1x64xf32> to vector<1x1x64xf32>
    %130 = vector.broadcast %129 : vector<1x1x64xf32> to vector<2x8x64xf32>
    %131 = arith.addf %128, %130 : vector<2x8x64xf32>
    %132 = arith.mulf %131, %131 : vector<2x8x64xf32>
    %133 = arith.mulf %131, %132 : vector<2x8x64xf32>
    %cst_68 = arith.constant 4.471500e-02 : f32
    %134 = vector.broadcast %cst_68 : f32 to vector<2x8x64xf32>
    %135 = arith.mulf %134, %133 : vector<2x8x64xf32>
    %136 = arith.addf %131, %135 : vector<2x8x64xf32>
    %cst_69 = arith.constant 0.797884583 : f32
    %137 = vector.broadcast %cst_69 : f32 to vector<2x8x64xf32>
    %138 = arith.mulf %137, %136 : vector<2x8x64xf32>
    %139 = math.tanh %138 : vector<2x8x64xf32>
    %cst_70 = arith.constant 1.000000e+00 : f32
    %140 = vector.broadcast %cst_70 : f32 to vector<2x8x64xf32>
    %141 = arith.addf %140, %139 : vector<2x8x64xf32>
    %cst_71 = arith.constant 5.000000e-01 : f32
    %142 = vector.broadcast %cst_71 : f32 to vector<2x8x64xf32>
    %143 = arith.mulf %142, %141 : vector<2x8x64xf32>
    %144 = arith.mulf %131, %143 : vector<2x8x64xf32>
    %145 = arith.truncf %144 : vector<2x8x64xf32> to vector<2x8x64xbf16>
    "tpu.trace_start"() <{level = 10 : i32, message = "bsf,fh->bsh"}> : () -> ()
    %cst_72 = arith.constant dense<0.000000e+00> : vector<2x8x32xf32>
    %146 = tpu.matmul %145, %57, %cst_72 {dimension_numbers = #tpu.dot_dimension_numbers<[2], [0], [0, 1], [1], [0, 0, 0, 1, 1, 1], [], []>} : vector<2x8x64xbf16>, vector<64x32xbf16>, vector<2x8x32xf32> -> vector<2x8x32xf32>
    "tpu.trace_stop"() : () -> ()
    %147 = vector.shape_cast %59 : vector<1x32xf32> to vector<1x1x32xf32>
    %148 = vector.broadcast %147 : vector<1x1x32xf32> to vector<2x8x32xf32>
    %149 = arith.addf %146, %148 : vector<2x8x32xf32>
    %150 = arith.addf %149, %126 : vector<2x8x32xf32>
    %cst_73 = arith.constant dense<0.000000e+00> : vector<2x8xf32>
    %151 = vector.multi_reduction <add>, %150, %cst_73 [2] : vector<2x8x32xf32> to vector<2x8xf32>
    %152 = vector.shape_cast %151 : vector<2x8xf32> to vector<2x8x1xf32>
    %cst_74 = arith.constant 3.200000e+01 : f32
    %153 = vector.broadcast %cst_74 : f32 to vector<2x8x1xf32>
    %154 = arith.divf %152, %153 : vector<2x8x1xf32>
    %155 = vector.broadcast %154 : vector<2x8x1xf32> to vector<2x8x32xf32>
    %156 = arith.subf %150, %155 : vector<2x8x32xf32>
    %157 = arith.mulf %156, %156 : vector<2x8x32xf32>
    %cst_75 = arith.constant dense<0.000000e+00> : vector<2x8xf32>
    %158 = vector.multi_reduction <add>, %157, %cst_75 [2] : vector<2x8x32xf32> to vector<2x8xf32>
    %159 = vector.shape_cast %158 : vector<2x8xf32> to vector<2x8x1xf32>
    %cst_76 = arith.constant 3.200000e+01 : f32
    %160 = vector.broadcast %cst_76 : f32 to vector<2x8x1xf32>
    %161 = arith.divf %159, %160 : vector<2x8x1xf32>
    %162 = vector.broadcast %154 : vector<2x8x1xf32> to vector<2x8x32xf32>
    %163 = arith.subf %150, %162 : vector<2x8x32xf32>
    %cst_77 = arith.constant 9.99999996E-13 : f32
    %164 = vector.broadcast %cst_77 : f32 to vector<2x8x1xf32>
    %165 = arith.addf %161, %164 : vector<2x8x1xf32>
    %166 = math.rsqrt %165 : vector<2x8x1xf32>
    %167 = vector.broadcast %166 : vector<2x8x1xf32> to vector<2x8x32xf32>
    %168 = arith.mulf %163, %167 : vector<2x8x32xf32>
    %169 = vector.shape_cast %61 : vector<1x32xf32> to vector<1x1x32xf32>
    %170 = vector.broadcast %169 : vector<1x1x32xf32> to vector<2x8x32xf32>
    %171 = arith.mulf %168, %170 : vector<2x8x32xf32>
    %172 = vector.shape_cast %63 : vector<1x32xf32> to vector<1x1x32xf32>
    %173 = vector.broadcast %172 : vector<1x1x32xf32> to vector<2x8x32xf32>
    %174 = arith.addf %171, %173 : vector<2x8x32xf32>
    %c1 = arith.constant 1 : index
    %c0_78 = arith.constant 0 : index
    %c0_79 = arith.constant 0 : index
    %175 = vector.load %arg6[%c1, %c0_78, %c0_79] : memref<2x32x96xbf16, #tpu.memory_space<vmem>>, vector<1x32x96xbf16>
    %176 = vector.shape_cast %175 : vector<1x32x96xbf16> to vector<32x96xbf16>
    %c1_80 = arith.constant 1 : index
    %c0_81 = arith.constant 0 : index
    %c0_82 = arith.constant 0 : index
    %177 = vector.load %arg7[%c1_80, %c0_81, %c0_82] : memref<2x1x96xf32, #tpu.memory_space<vmem>>, vector<1x1x96xf32>
    %178 = vector.shape_cast %177 : vector<1x1x96xf32> to vector<1x96xf32>
    %c1_83 = arith.constant 1 : index
    %c0_84 = arith.constant 0 : index
    %c0_85 = arith.constant 0 : index
    %179 = vector.load %arg8[%c1_83, %c0_84, %c0_85] : memref<2x32x32xbf16, #tpu.memory_space<vmem>>, vector<1x32x32xbf16>
    %180 = vector.shape_cast %179 : vector<1x32x32xbf16> to vector<32x32xbf16>
    %c1_86 = arith.constant 1 : index
    %c0_87 = arith.constant 0 : index
    %c0_88 = arith.constant 0 : index
    %181 = vector.load %arg9[%c1_86, %c0_87, %c0_88] : memref<2x1x32xf32, #tpu.memory_space<vmem>>, vector<1x1x32xf32>
    %182 = vector.shape_cast %181 : vector<1x1x32xf32> to vector<1x32xf32>
    %c1_89 = arith.constant 1 : index
    %c0_90 = arith.constant 0 : index
    %c0_91 = arith.constant 0 : index
    %183 = vector.load %arg10[%c1_89, %c0_90, %c0_91] : memref<2x1x32xf32, #tpu.memory_space<vmem>>, vector<1x1x32xf32>
    %184 = vector.shape_cast %183 : vector<1x1x32xf32> to vector<1x32xf32>
    %c1_92 = arith.constant 1 : index
    %c0_93 = arith.constant 0 : index
    %c0_94 = arith.constant 0 : index
    %185 = vector.load %arg11[%c1_92, %c0_93, %c0_94] : memref<2x1x32xf32, #tpu.memory_space<vmem>>, vector<1x1x32xf32>
    %186 = vector.shape_cast %185 : vector<1x1x32xf32> to vector<1x32xf32>
    %c1_95 = arith.constant 1 : index
    %c0_96 = arith.constant 0 : index
    %c0_97 = arith.constant 0 : index
    %187 = vector.load %arg12[%c1_95, %c0_96, %c0_97] : memref<2x32x64xbf16, #tpu.memory_space<vmem>>, vector<1x32x64xbf16>
    %188 = vector.shape_cast %187 : vector<1x32x64xbf16> to vector<32x64xbf16>
    %c1_98 = arith.constant 1 : index
    %c0_99 = arith.constant 0 : index
    %c0_100 = arith.constant 0 : index
    %189 = vector.load %arg13[%c1_98, %c0_99, %c0_100] : memref<2x1x64xf32, #tpu.memory_space<vmem>>, vector<1x1x64xf32>
    %190 = vector.shape_cast %189 : vector<1x1x64xf32> to vector<1x64xf32>
    %c1_101 = arith.constant 1 : index
    %c0_102 = arith.constant 0 : index
    %c0_103 = arith.constant 0 : index
    %191 = vector.load %arg14[%c1_101, %c0_102, %c0_103] : memref<2x64x32xbf16, #tpu.memory_space<vmem>>, vector<1x64x32xbf16>
    %192 = vector.shape_cast %191 : vector<1x64x32xbf16> to vector<64x32xbf16>
    %c1_104 = arith.constant 1 : index
    %c0_105 = arith.constant 0 : index
    %c0_106 = arith.constant 0 : index
    %193 = vector.load %arg15[%c1_104, %c0_105, %c0_106] : memref<2x1x32xf32, #tpu.memory_space<vmem>>, vector<1x1x32xf32>
    %194 = vector.shape_cast %193 : vector<1x1x32xf32> to vector<1x32xf32>
    %c1_107 = arith.constant 1 : index
    %c0_108 = arith.constant 0 : index
    %c0_109 = arith.constant 0 : index
    %195 = vector.load %arg16[%c1_107, %c0_108, %c0_109] : memref<2x1x32xf32, #tpu.memory_space<vmem>>, vector<1x1x32xf32>
    %196 = vector.shape_cast %195 : vector<1x1x32xf32> to vector<1x32xf32>
    %c1_110 = arith.constant 1 : index
    %c0_111 = arith.constant 0 : index
    %c0_112 = arith.constant 0 : index
    %197 = vector.load %arg17[%c1_110, %c0_111, %c0_112] : memref<2x1x32xf32, #tpu.memory_space<vmem>>, vector<1x1x32xf32>
    %198 = vector.shape_cast %197 : vector<1x1x32xf32> to vector<1x32xf32>
    %199 = arith.truncf %174 : vector<2x8x32xf32> to vector<2x8x32xbf16>
    "tpu.trace_start"() <{level = 10 : i32, message = "bsh,hd->bsd"}> : () -> ()
    %cst_113 = arith.constant dense<0.000000e+00> : vector<2x8x96xf32>
    %200 = tpu.matmul %199, %176, %cst_113 {dimension_numbers = #tpu.dot_dimension_numbers<[2], [0], [0, 1], [1], [0, 0, 0, 1, 1, 1], [], []>} : vector<2x8x32xbf16>, vector<32x96xbf16>, vector<2x8x96xf32> -> vector<2x8x96xf32>
    "tpu.trace_stop"() : () -> ()
    %201 = vector.shape_cast %178 : vector<1x96xf32> to vector<1x1x96xf32>
    %202 = vector.broadcast %201 : vector<1x1x96xf32> to vector<2x8x96xf32>
    %203 = arith.addf %200, %202 : vector<2x8x96xf32>
    %204 = vector.extract_strided_slice %203 {offsets = [0, 0, 0], sizes = [2, 8, 32], strides = [1, 1, 1]} : vector<2x8x96xf32> to vector<2x8x32xf32>
    %205 = vector.extract_strided_slice %203 {offsets = [0, 0, 32], sizes = [2, 8, 32], strides = [1, 1, 1]} : vector<2x8x96xf32> to vector<2x8x32xf32>
    %206 = vector.extract_strided_slice %203 {offsets = [0, 0, 64], sizes = [2, 8, 32], strides = [1, 1, 1]} : vector<2x8x96xf32> to vector<2x8x32xf32>
    %207 = vector.extract_strided_slice %204 {offsets = [0, 0, 0], sizes = [2, 8, 16], strides = [1, 1, 1]} : vector<2x8x32xf32> to vector<2x8x16xf32>
    %208 = vector.extract_strided_slice %204 {offsets = [0, 0, 16], sizes = [2, 8, 16], strides = [1, 1, 1]} : vector<2x8x32xf32> to vector<2x8x16xf32>
    %209 = tpu.concatenate %207, %208 in 0 : vector<2x8x16xf32>, vector<2x8x16xf32> -> vector<4x8x16xf32>
    %210 = vector.extract_strided_slice %205 {offsets = [0, 0, 0], sizes = [2, 8, 16], strides = [1, 1, 1]} : vector<2x8x32xf32> to vector<2x8x16xf32>
    %211 = vector.extract_strided_slice %205 {offsets = [0, 0, 16], sizes = [2, 8, 16], strides = [1, 1, 1]} : vector<2x8x32xf32> to vector<2x8x16xf32>
    %212 = tpu.concatenate %210, %211 in 0 : vector<2x8x16xf32>, vector<2x8x16xf32> -> vector<4x8x16xf32>
    %213 = vector.extract_strided_slice %206 {offsets = [0, 0, 0], sizes = [2, 8, 16], strides = [1, 1, 1]} : vector<2x8x32xf32> to vector<2x8x16xf32>
    %214 = vector.extract_strided_slice %206 {offsets = [0, 0, 16], sizes = [2, 8, 16], strides = [1, 1, 1]} : vector<2x8x32xf32> to vector<2x8x16xf32>
    %215 = tpu.concatenate %213, %214 in 0 : vector<2x8x16xf32>, vector<2x8x16xf32> -> vector<4x8x16xf32>
    "tpu.trace_start"() <{level = 10 : i32, message = "bqd,bkd->bqk"}> : () -> ()
    %cst_114 = arith.constant dense<0.000000e+00> : vector<4x8x8xf32>
    %216 = tpu.matmul %209, %212, %cst_114 {dimension_numbers = #tpu.dot_dimension_numbers<[2], [2], [1], [1], [0, 0, 0, 1, 1, 1], [0], [0]>} : vector<4x8x16xf32>, vector<4x8x16xf32>, vector<4x8x8xf32> -> vector<4x8x8xf32>
    "tpu.trace_stop"() : () -> ()
    %cst_115 = arith.constant 2.500000e-01 : f32
    %217 = vector.broadcast %cst_115 : f32 to vector<4x8x8xf32>
    %218 = arith.mulf %216, %217 : vector<4x8x8xf32>
    %cst_116 = arith.constant dense<0xFF800000> : vector<4x8xf32>
    %219 = vector.multi_reduction <maximumf>, %218, %cst_116 [2] : vector<4x8x8xf32> to vector<4x8xf32>
    %220 = vector.shape_cast %219 : vector<4x8xf32> to vector<4x8x1xf32>
    %221 = vector.broadcast %220 : vector<4x8x1xf32> to vector<4x8x8xf32>
    %222 = arith.subf %218, %221 : vector<4x8x8xf32>
    %223 = math.exp %222 : vector<4x8x8xf32>
    %cst_117 = arith.constant dense<0.000000e+00> : vector<4x8xf32>
    %224 = vector.multi_reduction <add>, %223, %cst_117 [2] : vector<4x8x8xf32> to vector<4x8xf32>
    %225 = vector.shape_cast %224 : vector<4x8xf32> to vector<4x8x1xf32>
    %226 = vector.broadcast %225 : vector<4x8x1xf32> to vector<4x8x8xf32>
    %227 = arith.divf %223, %226 : vector<4x8x8xf32>
    "tpu.trace_start"() <{level = 10 : i32, message = "bqk,bkd->bqd"}> : () -> ()
    %cst_118 = arith.constant dense<0.000000e+00> : vector<4x8x16xf32>
    %228 = tpu.matmul %227, %215, %cst_118 {dimension_numbers = #tpu.dot_dimension_numbers<[2], [1], [1], [2], [0, 0, 0, 1, 1, 2], [0], [0]>} : vector<4x8x8xf32>, vector<4x8x16xf32>, vector<4x8x16xf32> -> vector<4x8x16xf32>
    "tpu.trace_stop"() : () -> ()
    %229 = vector.extract_strided_slice %228 {offsets = [0, 0, 0], sizes = [2, 8, 16], strides = [1, 1, 1]} : vector<4x8x16xf32> to vector<2x8x16xf32>
    %230 = vector.extract_strided_slice %228 {offsets = [2, 0, 0], sizes = [2, 8, 16], strides = [1, 1, 1]} : vector<4x8x16xf32> to vector<2x8x16xf32>
    %231 = tpu.concatenate %229, %230 in 2 : vector<2x8x16xf32>, vector<2x8x16xf32> -> vector<2x8x32xf32>
    %232 = arith.truncf %231 : vector<2x8x32xf32> to vector<2x8x32xbf16>
    "tpu.trace_start"() <{level = 10 : i32, message = "bsh,hd->bsd"}> : () -> ()
    %cst_119 = arith.constant dense<0.000000e+00> : vector<2x8x32xf32>
    %233 = tpu.matmul %232, %180, %cst_119 {dimension_numbers = #tpu.dot_dimension_numbers<[2], [0], [0, 1], [1], [0, 0, 0, 1, 1, 1], [], []>} : vector<2x8x32xbf16>, vector<32x32xbf16>, vector<2x8x32xf32> -> vector<2x8x32xf32>
    "tpu.trace_stop"() : () -> ()
    %234 = vector.shape_cast %182 : vector<1x32xf32> to vector<1x1x32xf32>
    %235 = vector.broadcast %234 : vector<1x1x32xf32> to vector<2x8x32xf32>
    %236 = arith.addf %233, %235 : vector<2x8x32xf32>
    %237 = arith.addf %236, %174 : vector<2x8x32xf32>
    %cst_120 = arith.constant dense<0.000000e+00> : vector<2x8xf32>
    %238 = vector.multi_reduction <add>, %237, %cst_120 [2] : vector<2x8x32xf32> to vector<2x8xf32>
    %239 = vector.shape_cast %238 : vector<2x8xf32> to vector<2x8x1xf32>
    %cst_121 = arith.constant 3.200000e+01 : f32
    %240 = vector.broadcast %cst_121 : f32 to vector<2x8x1xf32>
    %241 = arith.divf %239, %240 : vector<2x8x1xf32>
    %242 = vector.broadcast %241 : vector<2x8x1xf32> to vector<2x8x32xf32>
    %243 = arith.subf %237, %242 : vector<2x8x32xf32>
    %244 = arith.mulf %243, %243 : vector<2x8x32xf32>
    %cst_122 = arith.constant dense<0.000000e+00> : vector<2x8xf32>
    %245 = vector.multi_reduction <add>, %244, %cst_122 [2] : vector<2x8x32xf32> to vector<2x8xf32>
    %246 = vector.shape_cast %245 : vector<2x8xf32> to vector<2x8x1xf32>
    %cst_123 = arith.constant 3.200000e+01 : f32
    %247 = vector.broadcast %cst_123 : f32 to vector<2x8x1xf32>
    %248 = arith.divf %246, %247 : vector<2x8x1xf32>
    %249 = vector.broadcast %241 : vector<2x8x1xf32> to vector<2x8x32xf32>
    %250 = arith.subf %237, %249 : vector<2x8x32xf32>
    %cst_124 = arith.constant 9.99999996E-13 : f32
    %251 = vector.broadcast %cst_124 : f32 to vector<2x8x1xf32>
    %252 = arith.addf %248, %251 : vector<2x8x1xf32>
    %253 = math.rsqrt %252 : vector<2x8x1xf32>
    %254 = vector.broadcast %253 : vector<2x8x1xf32> to vector<2x8x32xf32>
    %255 = arith.mulf %250, %254 : vector<2x8x32xf32>
    %256 = vector.shape_cast %184 : vector<1x32xf32> to vector<1x1x32xf32>
    %257 = vector.broadcast %256 : vector<1x1x32xf32> to vector<2x8x32xf32>
    %258 = arith.mulf %255, %257 : vector<2x8x32xf32>
    %259 = vector.shape_cast %186 : vector<1x32xf32> to vector<1x1x32xf32>
    %260 = vector.broadcast %259 : vector<1x1x32xf32> to vector<2x8x32xf32>
    %261 = arith.addf %258, %260 : vector<2x8x32xf32>
    %262 = arith.truncf %261 : vector<2x8x32xf32> to vector<2x8x32xbf16>
    "tpu.trace_start"() <{level = 10 : i32, message = "bsh,hf->bsf"}> : () -> ()
    %cst_125 = arith.constant dense<0.000000e+00> : vector<2x8x64xf32>
    %263 = tpu.matmul %262, %188, %cst_125 {dimension_numbers = #tpu.dot_dimension_numbers<[2], [0], [0, 1], [1], [0, 0, 0, 1, 1, 1], [], []>} : vector<2x8x32xbf16>, vector<32x64xbf16>, vector<2x8x64xf32> -> vector<2x8x64xf32>
    "tpu.trace_stop"() : () -> ()
    %264 = vector.shape_cast %190 : vector<1x64xf32> to vector<1x1x64xf32>
    %265 = vector.broadcast %264 : vector<1x1x64xf32> to vector<2x8x64xf32>
    %266 = arith.addf %263, %265 : vector<2x8x64xf32>
    %267 = arith.mulf %266, %266 : vector<2x8x64xf32>
    %268 = arith.mulf %266, %267 : vector<2x8x64xf32>
    %cst_126 = arith.constant 4.471500e-02 : f32
    %269 = vector.broadcast %cst_126 : f32 to vector<2x8x64xf32>
    %270 = arith.mulf %269, %268 : vector<2x8x64xf32>
    %271 = arith.addf %266, %270 : vector<2x8x64xf32>
    %cst_127 = arith.constant 0.797884583 : f32
    %272 = vector.broadcast %cst_127 : f32 to vector<2x8x64xf32>
    %273 = arith.mulf %272, %271 : vector<2x8x64xf32>
    %274 = math.tanh %273 : vector<2x8x64xf32>
    %cst_128 = arith.constant 1.000000e+00 : f32
    %275 = vector.broadcast %cst_128 : f32 to vector<2x8x64xf32>
    %276 = arith.addf %275, %274 : vector<2x8x64xf32>
    %cst_129 = arith.constant 5.000000e-01 : f32
    %277 = vector.broadcast %cst_129 : f32 to vector<2x8x64xf32>
    %278 = arith.mulf %277, %276 : vector<2x8x64xf32>
    %279 = arith.mulf %266, %278 : vector<2x8x64xf32>
    %280 = arith.truncf %279 : vector<2x8x64xf32> to vector<2x8x64xbf16>
    "tpu.trace_start"() <{level = 10 : i32, message = "bsf,fh->bsh"}> : () -> ()
    %cst_130 = arith.constant dense<0.000000e+00> : vector<2x8x32xf32>
    %281 = tpu.matmul %280, %192, %cst_130 {dimension_numbers = #tpu.dot_dimension_numbers<[2], [0], [0, 1], [1], [0, 0, 0, 1, 1, 1], [], []>} : vector<2x8x64xbf16>, vector<64x32xbf16>, vector<2x8x32xf32> -> vector<2x8x32xf32>
    "tpu.trace_stop"() : () -> ()
    %282 = vector.shape_cast %194 : vector<1x32xf32> to vector<1x1x32xf32>
    %283 = vector.broadcast %282 : vector<1x1x32xf32> to vector<2x8x32xf32>
    %284 = arith.addf %281, %283 : vector<2x8x32xf32>
    %285 = arith.addf %284, %261 : vector<2x8x32xf32>
    %cst_131 = arith.constant dense<0.000000e+00> : vector<2x8xf32>
    %286 = vector.multi_reduction <add>, %285, %cst_131 [2] : vector<2x8x32xf32> to vector<2x8xf32>
    %287 = vector.shape_cast %286 : vector<2x8xf32> to vector<2x8x1xf32>
    %cst_132 = arith.constant 3.200000e+01 : f32
    %288 = vector.broadcast %cst_132 : f32 to vector<2x8x1xf32>
    %289 = arith.divf %287, %288 : vector<2x8x1xf32>
    %290 = vector.broadcast %289 : vector<2x8x1xf32> to vector<2x8x32xf32>
    %291 = arith.subf %285, %290 : vector<2x8x32xf32>
    %292 = arith.mulf %291, %291 : vector<2x8x32xf32>
    %cst_133 = arith.constant dense<0.000000e+00> : vector<2x8xf32>
    %293 = vector.multi_reduction <add>, %292, %cst_133 [2] : vector<2x8x32xf32> to vector<2x8xf32>
    %294 = vector.shape_cast %293 : vector<2x8xf32> to vector<2x8x1xf32>
    %cst_134 = arith.constant 3.200000e+01 : f32
    %295 = vector.broadcast %cst_134 : f32 to vector<2x8x1xf32>
    %296 = arith.divf %294, %295 : vector<2x8x1xf32>
    %297 = vector.broadcast %289 : vector<2x8x1xf32> to vector<2x8x32xf32>
    %298 = arith.subf %285, %297 : vector<2x8x32xf32>
    %cst_135 = arith.constant 9.99999996E-13 : f32
    %299 = vector.broadcast %cst_135 : f32 to vector<2x8x1xf32>
    %300 = arith.addf %296, %299 : vector<2x8x1xf32>
    %301 = math.rsqrt %300 : vector<2x8x1xf32>
    %302 = vector.broadcast %301 : vector<2x8x1xf32> to vector<2x8x32xf32>
    %303 = arith.mulf %298, %302 : vector<2x8x32xf32>
    %304 = vector.shape_cast %196 : vector<1x32xf32> to vector<1x1x32xf32>
    %305 = vector.broadcast %304 : vector<1x1x32xf32> to vector<2x8x32xf32>
    %306 = arith.mulf %303, %305 : vector<2x8x32xf32>
    %307 = vector.shape_cast %198 : vector<1x32xf32> to vector<1x1x32xf32>
    %308 = vector.broadcast %307 : vector<1x1x32xf32> to vector<2x8x32xf32>
    %309 = arith.addf %306, %308 : vector<2x8x32xf32>
    %310 = vector.extract_strided_slice %309 {offsets = [0, 0, 0], sizes = [2, 1, 32], strides = [1, 1, 1]} : vector<2x8x32xf32> to vector<2x1x32xf32>
    %311 = arith.truncf %310 : vector<2x1x32xf32> to vector<2x1x32xbf16>
    %c0_136 = arith.constant 0 : index
    %c0_137 = arith.constant 0 : index
    %312 = vector.load %arg18[%c0_136, %c0_137] : memref<32x32xbf16, #tpu.memory_space<vmem>>, vector<32x32xbf16>
    "tpu.trace_start"() <{level = 10 : i32, message = "bsh,hd->bsd"}> : () -> ()
    %cst_138 = arith.constant dense<0.000000e+00> : vector<2x1x32xf32>
    %313 = tpu.matmul %311, %312, %cst_138 {dimension_numbers = #tpu.dot_dimension_numbers<[2], [0], [0, 1], [1], [0, 0, 0, 1, 1, 1], [], []>} : vector<2x1x32xbf16>, vector<32x32xbf16>, vector<2x1x32xf32> -> vector<2x1x32xf32>
    "tpu.trace_stop"() : () -> ()
    %c0_139 = arith.constant 0 : index
    %c0_140 = arith.constant 0 : index
    %314 = vector.load %arg19[%c0_139, %c0_140] : memref<1x32xf32, #tpu.memory_space<vmem>>, vector<1x32xf32>
    %315 = vector.shape_cast %314 : vector<1x32xf32> to vector<1x1x32xf32>
    %316 = vector.broadcast %315 : vector<1x1x32xf32> to vector<2x1x32xf32>
    %317 = arith.addf %313, %316 : vector<2x1x32xf32>
    %318 = math.tanh %317 : vector<2x1x32xf32>
    %319 = arith.truncf %318 : vector<2x1x32xf32> to vector<2x1x32xbf16>
    %c0_141 = arith.constant 0 : index
    %c0_142 = arith.constant 0 : index
    %320 = vector.load %arg20[%c0_141, %c0_142] : memref<32x3xbf16, #tpu.memory_space<vmem>>, vector<32x3xbf16>
    "tpu.trace_start"() <{level = 10 : i32, message = "bsh,hc->bsc"}> : () -> ()
    %cst_143 = arith.constant dense<0.000000e+00> : vector<2x1x3xf32>
    %321 = tpu.matmul %319, %320, %cst_143 {dimension_numbers = #tpu.dot_dimension_numbers<[2], [0], [0, 1], [1], [0, 0, 0, 1, 1, 1], [], []>} : vector<2x1x32xbf16>, vector<32x3xbf16>, vector<2x1x3xf32> -> vector<2x1x3xf32>
    "tpu.trace_stop"() : () -> ()
    %c0_144 = arith.constant 0 : index
    %c0_145 = arith.constant 0 : index
    %322 = vector.load %arg21[%c0_144, %c0_145] : memref<1x3xf32, #tpu.memory_space<vmem>>, vector<1x3xf32>
    %323 = vector.shape_cast %322 : vector<1x3xf32> to vector<1x1x3xf32>
    %324 = vector.broadcast %323 : vector<1x1x3xf32> to vector<2x1x3xf32>
    %325 = arith.addf %321, %324 : vector<2x1x3xf32>
    %c0_146 = arith.constant 0 : index
    %c0_147 = arith.constant 0 : index
    %326 = vector.load %arg22[%c0_146, %c0_147] : memref<32x5xbf16, #tpu.memory_space<vmem>>, vector<32x5xbf16>
    "tpu.trace_start"() <{level = 10 : i32, message = "bsh,hc->bsc"}> : () -> ()
    %cst_148 = arith.constant dense<0.000000e+00> : vector<2x1x5xf32>
    %327 = tpu.matmul %319, %326, %cst_148 {dimension_numbers = #tpu.dot_dimension_numbers<[2], [0], [0, 1], [1], [0, 0, 0, 1, 1, 1], [], []>} : vector<2x1x32xbf16>, vector<32x5xbf16>, vector<2x1x5xf32> -> vector<2x1x5xf32>
    "tpu.trace_stop"() : () -> ()
    %c0_149 = arith.constant 0 : index
    %c0_150 = arith.constant 0 : index
    %328 = vector.load %arg23[%c0_149, %c0_150] : memref<1x5xf32, #tpu.memory_space<vmem>>, vector<1x5xf32>
    %329 = vector.shape_cast %328 : vector<1x5xf32> to vector<1x1x5xf32>
    %330 = vector.broadcast %329 : vector<1x1x5xf32> to vector<2x1x5xf32>
    %331 = arith.addf %327, %330 : vector<2x1x5xf32>
    %cst_151 = arith.constant dense<0xFF800000> : vector<2x1xf32>
    %332 = vector.multi_reduction <maximumf>, %325, %cst_151 [2] : vector<2x1x3xf32> to vector<2x1xf32>
    %333 = vector.shape_cast %332 : vector<2x1xf32> to vector<2x1x1xf32>
    %334 = vector.broadcast %333 : vector<2x1x1xf32> to vector<2x1x3xf32>
    %335 = arith.subf %325, %334 : vector<2x1x3xf32>
    %336 = math.exp %335 : vector<2x1x3xf32>
    %cst_152 = arith.constant dense<0.000000e+00> : vector<2x1xf32>
    %337 = vector.multi_reduction <add>, %336, %cst_152 [2] : vector<2x1x3xf32> to vector<2x1xf32>
    %338 = vector.shape_cast %337 : vector<2x1xf32> to vector<2x1x1xf32>
    %339 = vector.broadcast %338 : vector<2x1x1xf32> to vector<2x1x3xf32>
    %340 = arith.divf %336, %339 : vector<2x1x3xf32>
    %c0_153 = arith.constant 0 : index
    %c0_154 = arith.constant 0 : index
    %c0_155 = arith.constant 0 : index
    %341 = vector.load %arg24[%c0_153, %c0_154, %c0_155] : memref<2x1x3xf32, #tpu.memory_space<vmem>>, vector<2x1x3xf32>
    tpu.vector_store %arg24[%c0_153, %c0_154, %c0_155], %340 {strides = array<i32>} : memref<2x1x3xf32, #tpu.memory_space<vmem>>, vector<2x1x3xf32>,
    %cst_156 = arith.constant dense<0xFF800000> : vector<2x1xf32>
    %342 = vector.multi_reduction <maximumf>, %331, %cst_156 [2] : vector<2x1x5xf32> to vector<2x1xf32>
    %343 = vector.shape_cast %342 : vector<2x1xf32> to vector<2x1x1xf32>
    %344 = vector.broadcast %343 : vector<2x1x1xf32> to vector<2x1x5xf32>
    %345 = arith.subf %331, %344 : vector<2x1x5xf32>
    %346 = math.exp %345 : vector<2x1x5xf32>
    %cst_157 = arith.constant dense<0.000000e+00> : vector<2x1xf32>
    %347 = vector.multi_reduction <add>, %346, %cst_157 [2] : vector<2x1x5xf32> to vector<2x1xf32>
    %348 = vector.shape_cast %347 : vector<2x1xf32> to vector<2x1x1xf32>
    %349 = vector.broadcast %348 : vector<2x1x1xf32> to vector<2x1x5xf32>
    %350 = arith.divf %346, %349 : vector<2x1x5xf32>
    %c0_158 = arith.constant 0 : index
    %c0_159 = arith.constant 0 : index
    %c0_160 = arith.constant 0 : index
    %351 = vector.load %arg25[%c0_158, %c0_159, %c0_160] : memref<2x1x5xf32, #tpu.memory_space<vmem>>, vector<2x1x5xf32>
    tpu.vector_store %arg25[%c0_158, %c0_159, %c0_160], %350 {strides = array<i32>} : memref<2x1x5xf32, #tpu.memory_space<vmem>>, vector<2x1x5xf32>,
    return
  }
}

</mosaic_0001>

<bundles_post_ra>
// kernel: mybert_forward.1
= control target key start
LH: loop header
LB: loop body
LE: loop exit
PB: predicated region body
PF: predicated region fallthrough
CT: control target
= control target key end

     0   :  { %s4097_s0 = inlined_call_operand.vmem [shape: s32[2,8,1], index: 0, kind: input, shape index: {}]   ;;  %s4098_s1 = inlined_call_operand.vmem [shape: f32[100,32], index: 1, kind: input, shape index: {}]   ;;  %s4099_s2 = inlined_call_operand.vmem [shape: f32[1,8,32], index: 2, kind: input, shape index: {}]   ;;  %s4100_s3 = inlined_call_operand.vmem [shape: f32[1,1,32], index: 3, kind: input, shape index: {}]   ;;  %s4101_s4 = inlined_call_operand.vmem [shape: f32[1,32], index: 4, kind: input, shape index: {}]   ;;  %s4102_s5 = inlined_call_operand.vmem [shape: f32[1,32], index: 5, kind: input, shape index: {}]   ;;  %s4103_s6 = inlined_call_operand.vmem [shape: bf16[2,32,96], index: 6, kind: input, shape index: {}]   ;;  %s4104_s7 = inlined_call_operand.vmem [shape: f32[2,1,96], index: 7, kind: input, shape index: {}]   ;;  %s4105_s8 = inlined_call_operand.vmem [shape: bf16[2,32,32], index: 8, kind: input, shape index: {}]   ;;  %s4106_s9 = inlined_call_operand.vmem [shape: f32[2,1,32], index: 9, kind: input, shape index: {}]   ;;  %s4107_s10 = inlined_call_operand.vmem [shape: f32[2,1,32], index: 10, kind: input, shape index: {}]   ;;  %s4108_s11 = inlined_call_operand.vmem [shape: f32[2,1,32], index: 11, kind: input, shape index: {}]   ;;  %s4109_s12 = inlined_call_operand.vmem [shape: bf16[2,32,64], index: 12, kind: input, shape index: {}]   ;;  %s4110_s13 = inlined_call_operand.vmem [shape: f32[2,1,64], index: 13, kind: input, shape index: {}]   ;;  %s4111_s14 = inlined_call_operand.vmem [shape: bf16[2,64,32], index: 14, kind: input, shape index: {}]   ;;  %s4112_s15 = inlined_call_operand.vmem [shape: f32[2,1,32], index: 15, kind: input, shape index: {}]   ;;  %s4113_s16 = inlined_call_operand.vmem [shape: f32[2,1,32], index: 16, kind: input, shape index: {}]   ;;  %s4114_s17 = inlined_call_operand.vmem [shape: f32[2,1,32], index: 17, kind: input, shape index: {}]   ;;  %s4115_s18 = inlined_call_operand.vmem [shape: bf16[32,32], index: 18, kind: input, shape index: {}]   ;;  %s4116_s19 = inlined_call_operand.vmem [shape: f32[1,32], index: 19, kind: input, shape index: {}]   ;;  %s4117_s20 = inlined_call_operand.vmem [shape: bf16[32,3], index: 20, kind: input, shape index: {}]   ;;  %s4118_s21 = inlined_call_operand.vmem [shape: f32[1,3], index: 21, kind: input, shape index: {}]   ;;  %s4119_s22 = inlined_call_operand.vmem [shape: bf16[32,5], index: 22, kind: input, shape index: {}]   ;;  %s4120_s23 = inlined_call_operand.vmem [shape: f32[1,5], index: 23, kind: input, shape index: {}]   ;;  %s4121_s24 = inlined_call_operand.hbm [shape: f32[2,1,3], index: 24, kind: output, shape index: {0}]   ;;  %s4122_s25 = inlined_call_operand.hbm [shape: f32[2,1,5], index: 25, kind: output, shape index: {1}]  }
   0x1   :  { %4129 = sst [smem:[#allocation8_spill]] %s4097_s0 }
   0x2   :  { %4130 = sst [smem:[#allocation9_spill]] %s4098_s1 }
   0x3   :  { %4131 = sst [smem:[#allocation10_spill]] %s4099_s2 }
   0x4   :  { %4132 = sst [smem:[#allocation11_spill]] %s4100_s3 }
   0x5   :  { %4133 = sst [smem:[#allocation12_spill]] %s4101_s4 }
   0x6   :  { %4134 = sst [smem:[#allocation13_spill]] %s4102_s5 }
   0x7   :  { %4135 = sst [smem:[#allocation14_spill]] %s4103_s6 }
   0x8   :  { %4136 = sst [smem:[#allocation15_spill]] %s4104_s7 }
   0x9   :  { %4137 = sst [smem:[#allocation16_spill]] %s4105_s8 }
   0xa   :  { %4138 = sst [smem:[#allocation17_spill]] %s4106_s9 }
   0xb   :  { %31 = vsyncpa [#allocation3], 0  ;;  %s4139_s6 = sld [smem:[#allocation8_spill]]  ;;  %s4140_s3 = sld [smem:[#allocation9_spill]]  ;;  %v3483_v2 = vmov 0   ;;  %v3484_v11 = vmov 0.0  }
   0xc   :  { %3315 = vset.pattern.permute.xlu0 %v3483_v2  ;;  %3104 = vmatprep.subr.bf16.mxu1 %v3484_v11  ;;  %vm119_vm0 = vcmask 1043456  }
  0x11   :  { %v82_v0 = vld [vmem:[%s4139_s6] sm:$0xff]  ;;  %v99_v3 = vld [vmem:[%s4140_s3 + $0x8] sm:$0xff]  ;;  %v100_v4 = vld [vmem:[%s4140_s3 + $0x10] sm:$0xff] }
  0x12   :  { %v98_v1 = vld [vmem:[%s4140_s3] sm:$0xff]  ;;  %v101_v5 = vld [vmem:[%s4140_s3 + $0x18] sm:$0xff]  ;;  %87 = vperm.xlu0 %3315, %v82_v0   ;;  %v83_v8 = vld [vmem:[%s4139_s6 + $0x8] sm:$0xff] }
  0x13   :  { %v3280_v6 = vpack.c.bf16 %v99_v3, %v98_v1  ;;  %v3284_v7 = vpack.c.bf16 %v101_v5, %v100_v4  ;;  %v102_v9 = vld [vmem:[%s4140_s3 + $0x20] sm:$0xff]  ;;  %v103_v10 = vld [vmem:[%s4140_s3 + $0x28] sm:$0xff]  ;;  %v104_v12 = vld [vmem:[%s4140_s3 + $0x30] sm:$0xff] }
  0x14   :  { %v105_v13 = vld [vmem:[%s4140_s3 + $0x38] sm:$0xff]  ;;  %v3288_v14 = vpack.c.bf16 %v103_v10, %v102_v9  ;;  %v106_v15 = vld [vmem:[%s4140_s3 + $0x40] sm:$0xff]  ;;  %v107_v16 = vld [vmem:[%s4140_s3 + $0x48] sm:$0xff] }
  0x15   :  { %3281 = vmatprep.subr.bf16.mxu0 %v3280_v6  ;;  %v3292_v17 = vpack.c.bf16 %v105_v13, %v104_v12  ;;  %v108_v18 = vld [vmem:[%s4140_s3 + $0x50] sm:$0xff]  ;;  %v109_v19 = vld [vmem:[%s4140_s3 + $0x58] sm:$0xff]  ;;  %v3296_v20 = vpack.c.bf16 %v107_v16, %v106_v15  ;;  %v110_v22 = vld [vmem:[%s4140_s3 + $0x60] sm:$0xf] }
  0x16   :  { %3283 = vmatpush3.bf16.msra.mxu0 %v3280_v6  ;;  %90 = vperm.xlu0 %3315, %v83_v8   ;;  %v3300_v21 = vpack.c.bf16 %v109_v19, %v108_v18 }
  0x17   :  { %3285 = vmatprep.subr.bf16.mxu0 %v3284_v7 }
  0x1a   :  { %3287 = vmatpush3.bf16.msra.mxu0 %v3284_v7 }
  0x1b   :  { %3289 = vmatprep.subr.bf16.mxu0 %v3288_v14 }
  0x1e   :  { %3291 = vmatpush3.bf16.msra.mxu0 %v3288_v14 }
  0x1f   :  { %3293 = vmatprep.subr.bf16.mxu0 %v3292_v17 }
  0x22   :  { %3295 = vmatpush3.bf16.msra.mxu0 %v3292_v17 }
  0x23   :  { %3297 = vmatprep.subr.bf16.mxu0 %v3296_v20 }
  0x26   :  { %3299 = vmatpush3.bf16.msra.mxu0 %v3296_v20 }
  0x27   :  { %3301 = vmatprep.subr.bf16.mxu0 %v3300_v21 }
  0x28   :  { %32 = vsyncpa [#allocation5], 0  ;;  %v84_v23 = vlaneseq  ;;  %vm112_vm1 = vcmask 818176   ;;  %s4141_s26 = sld [smem:[#allocation10_spill]]  ;;  %s4142_s6 = sld [smem:[#allocation11_spill]]  ;;  %vm209_vm4 = vcmask 261120  }
  0x29   :  { %s4143_s28 = sld [smem:[#allocation14_spill]]  ;;  %vm3485_vm5 = vmmov 0   ;;  %s4144_s2 = sld [smem:[#allocation12_spill]]  ;;  %vm358_vm6 = vcmask 130048   ;;  %vm665_vm7 = vcmask 64512   ;;  %vm1261_vm8 = vcmask 523264  }
  0x2a   :  { %3303 = vmatpush3.bf16.msra.mxu0 %v3300_v21  ;;  %v85_v24 = vand.u32 127, %v84_v23  ;;  %3108 = vmatprep.mubr.msk.bf16.mxu1 %vm3485_vm5, %v3484_v11  ;;  %s4145_s7 = sld [smem:[#allocation13_spill]]  ;;  %s4146_s8 = sld [smem:[#allocation15_spill]]  ;;  %vm2468_vm9 = vcmask 1041409   ;;  %vm2780_vm10 = vcmask 16384   ;;  %vm2805_vm11 = vcmask 32768  }
  0x2b   :  { %3099 = vmatprep.subr.msk.mxu0 %vm119_vm0, %v110_v22  ;;  %s3487_s27 = smov 96   ;;  %s3488_s4 = smov 64  }
  0x2c   :  { %s4147_s0 = sld [smem:[#allocation16_spill]]  ;;  %s3489_s30 = smov 16  }
  0x2d   :  { %s3492_s9 = smov [#allocation4]  }
  0x2e   :  { %3100 = vmatpush3.msk.msra.mxu0 %vm119_vm0, %v110_v22  ;;  %v111_v29 = vld [vmem:[%s4141_s26] sm:$0xff]  ;;  %s4148_s26 = sld [smem:[#allocation17_spill]] }
  0x2f   :  { %3142 = vmatprep.subr.mxu0 %v3484_v11  ;;  %v2867_v32 = vld [vmem:[%s4142_s6] ss:$0 sm:$0xff]  ;;  %v3327_v50 = vld [vmem:[%s4143_s28 + $0x8] sm:$0xff]   ;;  %s3486_s6 = smov 112  }
  0x30   :  { %v3326_v49 = vld [vmem:[%s4143_s28] sm:$0xff]  }
  0x31   :  { %3105 = vmatpush3.bf16.msra.mxu1 %v3326_v49  ;;  %v2868_v59 = vld [vmem:[%s4144_s2] ss:$0 sm:$0xff] }
  0x32   :  { %3106 = vmatprep.subr.bf16.mxu1 %v3484_v11  ;;  %v2869_v63 = vld [vmem:[%s4145_s7] ss:$0 sm:$0xff] }
  0x33   :  { %v2870_v4 = vld [vmem:[%s4146_s8] ss:$0 sm:$0xff] }
  0x35   :  { %3107 = vmatpush3.bf16.msra.mxu1 %v3327_v50 }
  0x36   :  { %3112 = vmatprep.subr.mxu1 %v3484_v11 }
  0x91   :  { %v88_v25 = vpop.permute.xlu0 %87 }
  0x92   :  { %vm92_vm2 = vcmp.eq.s32.totalorder %v85_v24, %v88_v25 }
  0x93   :  { %v2862_v26 = vsel %vm92_vm2, 1.0, %v3484_v11 }
  0x94   :  { %3101 = vmatprep.mubr.msk.f32.mxu0 %vm112_vm1, %v2862_v26 }
  0x95   :  { %v91_v27 = vpop.permute.xlu0 %90 }
  0x96   :  { %vm93_vm3 = vcmp.eq.s32.totalorder %v85_v24, %v91_v27 }
  0x97   :  { %v2863_v28 = vsel %vm93_vm3, 1.0, %v3484_v11 }
  0x98   :  { %3102 = vmatmul.mubr.msk.f32.vlgmr.msra.gmra.mrb[0].mxu0 %vm112_vm1, %v2863_v28 }
  0x99   :  { %3144 = vmatprep.mubr.msk.f32.mxu0 %vm3485_vm5, %v3484_v11 }
 0x16b   :  { %v3103_v30 = vpop.f32.mrb[0].mxu0 }
 0x16c   :  { %v189_v31 = vpop.f32.mrb[1].mxu0  ;;  %v195_v33 = vadd.f32 %v3103_v30, %v111_v29 }
 0x16d   :  { %v190_v34 = vadd.f32 %v189_v31, %v111_v29 }
 0x16e   :  { %v206_v37 = vadd.f32 %v2867_v32, %v195_v33 }
 0x16f   :  { %v205_v35 = vadd.f32 %v2867_v32, %v190_v34 }
 0x170   :  { %v213_v38 = vsel %vm209_vm4, %v206_v37, 0.0 }
 0x171   :  { %v210_v36 = vsel %vm209_vm4, %v205_v35, 0.0 }
 0x172   :  { %211 = vadd.xlane.f32.xlu1 %v210_v36 }
 0x176   :  { %214 = vadd.xlane.f32.xlu1 %v213_v38 }
 0x1ff   :  { %v212_v39 = vpop.xlane.xlu1 %211 }
 0x200   :  { %v217_v40 = vmul.f32 0.03125, %v212_v39 }
 0x202   :  { %v219_v41 = vsub.f32 %v205_v35, %v217_v40 }
 0x203   :  { %v215_v42 = vpop.xlane.xlu1 %214 }
 0x204   :  { %v218_v43 = vmul.f32 0.03125, %v215_v42  ;;  %v221_v44 = vmul.f32 %v219_v41, %v219_v41 }
 0x206   :  { %v220_v45 = vsub.f32 %v206_v37, %v218_v43  ;;  %v223_v46 = vsel %vm209_vm4, %v221_v44, 0.0 }
 0x207   :  { %224 = vadd.xlane.f32.xlu0 %v223_v46 }
 0x208   :  { %v222_v47 = vmul.f32 %v220_v45, %v220_v45 }
 0x20a   :  { %v226_v48 = vsel %vm209_vm4, %v222_v47, 0.0 }
 0x20b   :  { %227 = vadd.xlane.f32.xlu1 %v226_v48 }
 0x294   :  { %v225_v51 = vpop.xlane.xlu0 %224 }
 0x295   :  { %v229_v52 = vmul.f32 0.03125, %v225_v51 }
 0x297   :  { %v231_v53 = vadd.f32 1e-12, %v229_v52 }
 0x298   :  { %v228_v54 = vpop.xlane.xlu1 %227 }
 0x299   :  { %3355 = vrsqrt.f32 %v231_v53  ;;  %v230_v55 = vmul.f32 0.03125, %v228_v54 }
 0x29b   :  { %v232_v56 = vadd.f32 1e-12, %v230_v55 }
 0x29d   :  { %3357 = vrsqrt.f32 %v232_v56 }
 0x2a3   :  { %v3356_v57 = vpop.eup %3355 }
 0x2a4   :  { %v235_v58 = vmul.f32 %v3356_v57, %v219_v41 }
 0x2a6   :  { %v243_v62 = vmul.f32 %v2868_v59, %v235_v58 }
 0x2a7   :  { %v3358_v60 = vpop.eup %3357 }
 0x2a8   :  { %v236_v61 = vmul.f32 %v3358_v60, %v220_v45  ;;  %v3702_v1 = vadd.f32 %v2869_v63, %v243_v62 }
 0x2aa   :  { %v244_v0 = vmul.f32 %v2868_v59, %v236_v61 }
 0x2ac   :  { %v3704_v2 = vadd.f32 %v2869_v63, %v244_v0 }
 0x2ae   :  { %v2983_v3 = vpack.c.bf16 %v3704_v2, %v3702_v1 }
 0x2b0   :  { %3109 = vmatmul.mubr.msk.bf16.vlgmr.msra.gmra.mrb[0].mxu1 %vm209_vm4, %v2983_v3 }
 0x2b1   :  { %3114 = vmatprep.mubr.msk.f32.mxu1 %vm3485_vm5, %v3484_v11 }
 0x383   :  { %v343_v5 = vpop.f32.mrb[0].mxu1 }
 0x384   :  { %v344_v6 = vadd.f32 %v2870_v4, %v343_v5  ;;  %v3110_v7 = vpop.f32.mrb[1].mxu1 }
 0x385   :  { %v346_v8 = vpop.f32.mrb[2].mxu1 }
 0x386   :  { %352 = vrot.lane.b32.xlu1 %v344_v6, %s3486_s6  ;;  %v3111_v9 = vpop.f32.mrb[3].mxu1  ;;  %v3715_v10 = vadd.f32 %v2870_v4, %v346_v8 }
 0x387   :  { %v3328_v9 = vld [vmem:[%s4147_s0] sm:$0xff]  }
 0x38a   :  { %354 = vrot.lane.b32.xlu1 %v3715_v10, %s3486_s6 }
 0x38e   :  { %356 = vrot.lane.b32.xlu1 %v344_v6, %s3487_s27 }
 0x392   :  { %433 = vrot.lane.b32.xlu1 %v3715_v10, %s3487_s27 }
 0x3f8   :  { %v3722_v12 = vpop.permute.xlu1 %352 }
 0x3f9   :  { %509 = vrot.lane.b32.xlu0 %v3722_v12, %s3487_s27 }
 0x3fc   :  { %v3726_v13 = vpop.permute.xlu1 %354 }
 0x3fd   :  { %585 = vrot.lane.b32.xlu1 %v3726_v13, %s3487_s27 }
 0x400   :  { %v357_v14 = vpop.permute.xlu1 %356 }
 0x401   :  { %3113 = vmatpush3.xpose.msk.msra.mxu1 %vm358_vm6, %v357_v14 }
 0x402   :  { %3117 = vmatprep.subr.mxu1 %v3484_v11 }
 0x404   :  { %3115 = vmatmul.mubr.msk.f32.vlgmr.msra.gmra.mrb[4].mxu1 %vm358_vm6, %v344_v6  ;;  %v434_v15 = vpop.permute.xlu1 %433 }
 0x405   :  { %3118 = vmatpush3.xpose.msk.msra.mxu1 %vm358_vm6, %v434_v15  ;;  %3119 = vmatprep.mubr.msk.f32.mxu1 %vm3485_vm5, %v3484_v11 }
 0x406   :  { %3122 = vmatprep.subr.mxu1 %v3484_v11 }
 0x408   :  { %3120 = vmatmul.mubr.msk.f32.vlgmr.msra.gmra.mrb[6].mxu1 %vm358_vm6, %v3715_v10 }
 0x409   :  { %3124 = vmatprep.mubr.msk.f32.mxu1 %vm3485_vm5, %v3484_v11 }
 0x46b   :  { %v510_v16 = vpop.permute.xlu0 %509 }
 0x46c   :  { %3123 = vmatpush3.xpose.msk.msra.mxu1 %vm358_vm6, %v510_v16 }
 0x46d   :  { %3127 = vmatprep.subr.mxu1 %v3484_v11 }
 0x46f   :  { %3125 = vmatmul.mubr.msk.f32.vlgmr.msra.gmra.mrb[8].mxu1 %vm358_vm6, %v3722_v12  ;;  %v586_v17 = vpop.permute.xlu1 %585 }
 0x470   :  { %3128 = vmatpush3.xpose.msk.msra.mxu1 %vm358_vm6, %v586_v17  ;;  %3129 = vmatprep.mubr.msk.f32.mxu1 %vm3485_vm5, %v3484_v11 }
 0x471   :  { %3132 = vmatprep.subr.mxu1 %v3484_v11 }
 0x473   :  { %3130 = vmatmul.mubr.msk.f32.vlgmr.msra.gmra.mrb[10].mxu1 %vm358_vm6, %v3726_v13 }
 0x474   :  { %3134 = vmatprep.mubr.msk.f32.mxu1 %vm3485_vm5, %v3484_v11 }
 0x4d7   :  { %v429_v18 = vpop.f32.mrb[4].mxu1 }
 0x4d8   :  { %v661_v19 = vmul.f32 0.25, %v429_v18  ;;  %v3116_v20 = vpop.f32.mrb[5].mxu1 }
 0x4da   :  { %v666_v21 = vsel %vm665_vm7, %v661_v19, -inf }
 0x4db   :  { %667 = vmax.xlane.f32.xlu1 %v666_v21  ;;  %v505_v22 = vpop.f32.mrb[6].mxu1 }
 0x4dc   :  { %v662_v24 = vmul.f32 0.25, %v505_v22  ;;  %v3121_v25 = vpop.f32.mrb[7].mxu1 }
 0x4de   :  { %v669_v26 = vsel %vm665_vm7, %v662_v24, -inf }
 0x4df   :  { %670 = vmax.xlane.f32.xlu0 %v669_v26 }
 0x542   :  { %v581_v27 = vpop.f32.mrb[8].mxu1 }
 0x543   :  { %v663_v28 = vmul.f32 0.25, %v581_v27  ;;  %v3126_v29 = vpop.f32.mrb[9].mxu1 }
 0x545   :  { %v672_v30 = vsel %vm665_vm7, %v663_v28, -inf }
 0x546   :  { %673 = vmax.xlane.f32.xlu1 %v672_v30  ;;  %v657_v31 = vpop.f32.mrb[10].mxu1 }
 0x547   :  { %v664_v32 = vmul.f32 0.25, %v657_v31  ;;  %v3131_v33 = vpop.f32.mrb[11].mxu1 }
 0x549   :  { %v675_v34 = vsel %vm665_vm7, %v664_v32, -inf }
 0x54a   :  { %676 = vmax.xlane.f32.xlu1 %v675_v34 }
 0x55b   :  { %710 = vrot.lane.b32.xlu1 %v344_v6, %s3488_s4 }
 0x568   :  { %v668_v35 = vpop.xlane.xlu1 %667 }
 0x569   :  { %v678_v36 = vsub.f32 %v661_v19, %v668_v35 }
 0x56b   :  { %v682_v37 = vmul.f32 1.442695, %v678_v36 }
 0x56c   :  { %v671_v38 = vpop.xlane.xlu0 %670 }
 0x56d   :  { %v679_v39 = vsub.f32 %v662_v24, %v671_v38  ;;  %3359 = vpow2.f32 %v682_v37 }
 0x56f   :  { %v684_v40 = vmul.f32 1.442695, %v679_v39 }
 0x571   :  { %3361 = vpow2.f32 %v684_v40 }
 0x577   :  { %v3360_v41 = vpop.eup %3359 }
 0x578   :  { %v690_v44 = vsel %vm665_vm7, %v3360_v41, 0.0 }
 0x57b   :  { %v3362_v42 = vpop.eup %3361 }
 0x57c   :  { %v693_v43 = vsel %vm665_vm7, %v3362_v42, 0.0 }
 0x57d   :  { %694 = vadd.xlane.f32.xlu0 %v693_v43 }
 0x57f   :  { %691 = vadd.xlane.f32.xlu1 %v690_v44 }
 0x5d3   :  { %v674_v45 = vpop.xlane.xlu1 %673 }
 0x5d4   :  { %v680_v46 = vsub.f32 %v663_v28, %v674_v45  ;;  %v2887_v28 = vld [vmem:[%s4148_s26] ss:$0 sm:$0xff] }
 0x5d6   :  { %v686_v47 = vmul.f32 1.442695, %v680_v46 }
 0x5d7   :  { %v677_v48 = vpop.xlane.xlu1 %676 }
 0x5d8   :  { %3363 = vpow2.f32 %v686_v47  ;;  %v681_v49 = vsub.f32 %v664_v32, %v677_v48  ;;  %v3331_v48 = vld [vmem:[%s4109_s12 + $0x8] sm:$0xff]  }
 0x5da   :  { %v688_v50 = vmul.f32 1.442695, %v681_v49 }
 0x5db   :  { %v711_v51 = vpop.permute.xlu1 %710 }
 0x5dc   :  { %3365 = vpow2.f32 %v688_v50  ;;  %3133 = vmatpush3.msra.mxu1 %v711_v51 }
 0x5dd   :  { %3137 = vmatprep.subr.mxu1 %v3484_v11 }
 0x5e2   :  { %v3364_v52 = vpop.eup %3363 }
 0x5e3   :  { %v696_v53 = vsel %vm665_vm7, %v3364_v52, 0.0 }
 0x5e4   :  { %697 = vadd.xlane.f32.xlu1 %v696_v53 }
 0x5e6   :  { %v3366_v54 = vpop.eup %3365 }
 0x5e7   :  { %v699_v55 = vsel %vm665_vm7, %v3366_v54, 0.0 }
 0x5e8   :  { %700 = vadd.xlane.f32.xlu0 %v699_v55 }
 0x5f5   :  { %862 = vrot.lane.b32.xlu1 %v3722_v12, %s3488_s4 }
 0x5f9   :  { %938 = vrot.lane.b32.xlu1 %v3726_v13, %s3488_s4  ;;  %v3329_v13 = vld [vmem:[%s4147_s0 + $0x8] sm:$0xff]  }
 0x5fe   :  { %786 = vrot.lane.b32.xlu0 %v3715_v10, %s3488_s4 }
 0x60a   :  { %v695_v59 = vpop.xlane.xlu0 %694 }
 0x60c   :  { %v692_v56 = vpop.xlane.xlu1 %691 }
 0x60d   :  { %3367 = vrcp.f32 %v692_v56  ;;  %v2892_v56 = vld [vmem:[%s4107_s10] ss:$0 sm:$0xff] }
 0x60e   :  { %3369 = vrcp.f32 %v695_v59 }
 0x617   :  { %v3368_v57 = vpop.eup %3367 }
 0x618   :  { %v703_v58 = vmul.f32 %v3368_v57, %v3360_v41  ;;  %v3370_v63 = vpop.eup %3369 }
 0x619   :  { %v705_v0 = vmul.f32 %v3370_v63, %v3362_v42 }
 0x61a   :  { %3135 = vmatmul.mubr.msk.f32.vlgmr.msra.gmra.mrb[12].mxu1 %vm665_vm7, %v703_v58 }
 0x61b   :  { %3139 = vmatprep.mubr.msk.f32.mxu1 %vm3485_vm5, %v3484_v11 }
 0x671   :  { %v698_v60 = vpop.xlane.xlu1 %697 }
 0x672   :  { %3371 = vrcp.f32 %v698_v60 }
 0x675   :  { %v701_v61 = vpop.xlane.xlu0 %700  ;;  %v863_v62 = vpop.permute.xlu1 %862 }
 0x676   :  { %3373 = vrcp.f32 %v701_v61  ;;  %3143 = vmatpush3.msra.mxu0 %v863_v62  ;;  %v2893_v61 = vld [vmem:[%s4108_s11] ss:$0 sm:$0xff] }
 0x677   :  { %3152 = vmatprep.subr.bf16.mxu0 %v3484_v11 }
 0x679   :  { %v787_v3 = vpop.permute.xlu0 %786  ;;  %v939_v4 = vpop.permute.xlu1 %938 }
 0x67a   :  { %3138 = vmatpush3.msra.mxu1 %v787_v3 }
 0x67b   :  { %3140 = vmatmul.mubr.msk.f32.vlgmr.msra.gmra.mrb[14].mxu1 %vm665_vm7, %v705_v0  ;;  %3147 = vmatprep.subr.mxu1 %v3484_v11 }
 0x67c   :  { %v3372_v5 = vpop.eup %3371  ;;  %3148 = vmatpush3.msra.mxu1 %v939_v4  ;;  %3149 = vmatprep.mubr.msk.f32.mxu1 %vm3485_vm5, %v3484_v11  ;;  %v3332_v4 = vld [vmem:[%s4111_s14] sm:$0xff]  }
 0x67d   :  { %v707_v6 = vmul.f32 %v3372_v5, %v3364_v52  ;;  %3160 = vmatprep.subr.bf16.mxu1 %v3484_v11  ;;  %v3333_v5 = vld [vmem:[%s4111_s14 + $0x8] sm:$0xff]  }
 0x67f   :  { %3145 = vmatmul.mubr.msk.f32.vlgmr.msra.gmra.mrb[2].mxu0 %vm665_vm7, %v707_v6  ;;  %v3334_v6 = vld [vmem:[%s4111_s14 + $0x10] sm:$0xff]  }
 0x680   :  { %v3374_v7 = vpop.eup %3373  ;;  %3156 = vmatprep.mubr.msk.bf16.mxu0 %vm3485_vm5, %v3484_v11  ;;  %3153 = vmatpush3.bf16.msra.mxu0 %v3328_v9 }
 0x681   :  { %v709_v8 = vmul.f32 %v3374_v7, %v3366_v54  ;;  %3154 = vmatprep.subr.bf16.mxu0 %v3484_v11  ;;  %v3335_v7 = vld [vmem:[%s4111_s14 + $0x18] sm:$0xff]  }
 0x683   :  { %3150 = vmatmul.mubr.msk.f32.vlgmr.msra.gmra.mrb[16].mxu1 %vm665_vm7, %v709_v8  ;;  %v2894_v8 = vld [vmem:[%s4110_s13] ss:$0 sm:$0xff] }
 0x684   :  { %3164 = vmatprep.mubr.msk.bf16.mxu1 %vm3485_vm5, %v3484_v11  ;;  %3155 = vmatpush3.bf16.msra.mxu0 %v3329_v13 }
 0x685   :  { %3168 = vmatprep.subr.bf16.mxu0 %v3484_v11 }
 0x6ed   :  { %v782_v10 = vpop.f32.mrb[12].mxu1 }
 0x6ee   :  { %v3136_v12 = vpop.f32.mrb[13].mxu1 }
 0x74e   :  { %v858_v14 = vpop.f32.mrb[14].mxu1 }
 0x74f   :  { %v3141_v15 = vpop.f32.mrb[15].mxu1 }
 0x752   :  { %v934_v16 = vpop.f32.mrb[2].mxu0 }
 0x753   :  { %v3146_v17 = vpop.f32.mrb[3].mxu0 }
 0x756   :  { %v1010_v18 = vpop.f32.mrb[16].mxu1 }
 0x757   :  { %v3316_v19 = vpack.i.bf16 %v1010_v18, %v934_v16  ;;  %v3151_v20 = vpop.f32.mrb[17].mxu1 }
 0x759   :  { %3317 = vrot.lane.b32.xlu0 %v3316_v19, %s3489_s30 }
 0x7cb   :  { %v3318_v21 = vpop.permute.xlu0 %3317 }
 0x7cc   :  { %v3320_v22 = vunpack.i.h.bf16 %v3318_v21  ;;  %v3319_v24 = vunpack.i.l.bf16 %v3318_v21 }
 0x7ce   :  { %v1023_v25 = vsel %vm358_vm6, %v858_v14, %v3320_v22  ;;  %v1022_v26 = vsel %vm358_vm6, %v782_v10, %v3319_v24 }
 0x7cf   :  { %v2984_v27 = vpack.c.bf16 %v1023_v25, %v1022_v26 }
 0x7d1   :  { %3157 = vmatmul.mubr.msk.bf16.vlgmr.msra.gmra.mrb[4].mxu0 %vm209_vm4, %v2984_v27 }
 0x7d2   :  { %3176 = vmatprep.mubr.msk.bf16.mxu0 %vm3485_vm5, %v3484_v11  ;;  %3169 = vmatpush3.bf16.msra.mxu0 %v3332_v4 }
 0x7d3   :  { %3170 = vmatprep.subr.bf16.mxu0 %v3484_v11 }
 0x7d6   :  { %3171 = vmatpush3.bf16.msra.mxu0 %v3333_v5 }
 0x7d7   :  { %3172 = vmatprep.subr.bf16.mxu0 %v3484_v11 }
 0x7da   :  { %3173 = vmatpush3.bf16.msra.mxu0 %v3334_v6 }
 0x7db   :  { %3174 = vmatprep.subr.bf16.mxu0 %v3484_v11 }
 0x7de   :  { %3175 = vmatpush3.bf16.msra.mxu0 %v3335_v7  ;;  %v2907_v7 = vld [vmem:[%s4114_s17] ss:$0 sm:$0xff] }
 0x7df   :  { %3198 = vmatprep.subr.mxu0 %v3484_v11 }
 0x8a4   :  { %v1086_v29 = vpop.f32.mrb[4].mxu0 }
 0x8a5   :  { %v1087_v30 = vadd.f32 %v2887_v28, %v1086_v29  ;;  %v3158_v31 = vpop.f32.mrb[5].mxu0 }
 0x8a6   :  { %v1089_v32 = vpop.f32.mrb[6].mxu0 }
 0x8a7   :  { %v1090_v33 = vadd.f32 %v2887_v28, %v1089_v32  ;;  %v3159_v34 = vpop.f32.mrb[7].mxu0  ;;  %v1093_v35 = vadd.f32 %v1087_v30, %v3702_v1 }
 0x8a9   :  { %v1095_v36 = vsel %vm209_vm4, %v1093_v35, 0.0  ;;  %v1094_v37 = vadd.f32 %v1090_v33, %v3704_v2  ;;  %v3330_v2 = vld [vmem:[%s4109_s12] sm:$0xff]  }
 0x8aa   :  { %1096 = vadd.xlane.f32.xlu1 %v1095_v36  ;;  %3161 = vmatpush3.bf16.msra.mxu1 %v3330_v2  ;;  %v2899_v36 = vld [vmem:[%s4112_s15] ss:$0 sm:$0xff] }
 0x8ab   :  { %v1098_v38 = vsel %vm209_vm4, %v1094_v37, 0.0  ;;  %3162 = vmatprep.subr.bf16.mxu1 %v3484_v11 }
 0x8ac   :  { %1099 = vadd.xlane.f32.xlu0 %v1098_v38 }
 0x8ae   :  { %3163 = vmatpush3.bf16.msra.mxu1 %v3331_v48 }
 0x8af   :  { %3180 = vmatprep.subr.bf16.mxu1 %v3484_v11 }
 0x937   :  { %v1097_v39 = vpop.xlane.xlu1 %1096 }
 0x938   :  { %v1101_v40 = vmul.f32 0.03125, %v1097_v39 }
 0x939   :  { %v1100_v41 = vpop.xlane.xlu0 %1099 }
 0x93a   :  { %v1103_v42 = vsub.f32 %v1093_v35, %v1101_v40  ;;  %v1102_v43 = vmul.f32 0.03125, %v1100_v41 }
 0x93c   :  { %v1104_v44 = vsub.f32 %v1094_v37, %v1102_v43  ;;  %v1105_v45 = vmul.f32 %v1103_v42, %v1103_v42 }
 0x93e   :  { %v1107_v46 = vsel %vm209_vm4, %v1105_v45, 0.0  ;;  %v1106_v47 = vmul.f32 %v1104_v44, %v1104_v44 }
 0x93f   :  { %1108 = vadd.xlane.f32.xlu0 %v1107_v46 }
 0x940   :  { %v1110_v1 = vsel %vm209_vm4, %v1106_v47, 0.0 }
 0x941   :  { %1111 = vadd.xlane.f32.xlu1 %v1110_v1 }
 0x9cc   :  { %v1109_v49 = vpop.xlane.xlu0 %1108 }
 0x9cd   :  { %v1113_v50 = vmul.f32 0.03125, %v1109_v49 }
 0x9ce   :  { %v1112_v51 = vpop.xlane.xlu1 %1111 }
 0x9cf   :  { %v1115_v52 = vadd.f32 1e-12, %v1113_v50  ;;  %v1114_v53 = vmul.f32 0.03125, %v1112_v51 }
 0x9d1   :  { %3375 = vrsqrt.f32 %v1115_v52  ;;  %v1116_v54 = vadd.f32 1e-12, %v1114_v53 }
 0x9d3   :  { %3377 = vrsqrt.f32 %v1116_v54 }
 0x9db   :  { %v3376_v55 = vpop.eup %3375 }
 0x9dc   :  { %v1119_v57 = vmul.f32 %v3376_v55, %v1103_v42  ;;  %v3336_v55 = vld [vmem:[%s4143_s28 + $0x10] sm:$0xff]  }
 0x9dd   :  { %v3378_v58 = vpop.eup %3377 }
 0x9de   :  { %v1127_v59 = vmul.f32 %v2892_v56, %v1119_v57  ;;  %v1120_v60 = vmul.f32 %v3378_v58, %v1104_v44 }
 0x9e0   :  { %v1128_v62 = vmul.f32 %v2892_v56, %v1120_v60  ;;  %v1135_v63 = vadd.f32 %v2893_v61, %v1127_v59  ;;  %v3337_v56 = vld [vmem:[%s4143_s28 + $0x18] sm:$0xff]  }
 0x9e2   :  { %v1136_v0 = vadd.f32 %v2893_v61, %v1128_v62 }
 0x9e4   :  { %v2985_v3 = vpack.c.bf16 %v1136_v0, %v1135_v63 }
 0x9e6   :  { %3165 = vmatmul.mubr.msk.bf16.vlgmr.msra.gmra.mrb[20].mxu1 %vm209_vm4, %v2985_v3 }
 0x9e7   :  { %3184 = vmatprep.mubr.msk.bf16.mxu1 %vm3485_vm5, %v3484_v11  ;;  %3181 = vmatpush3.bf16.msra.mxu1 %v3336_v55 }
 0x9e8   :  { %3182 = vmatprep.subr.bf16.mxu1 %v3484_v11 }
 0x9eb   :  { %3183 = vmatpush3.bf16.msra.mxu1 %v3337_v56 }
 0x9ec   :  { %3188 = vmatprep.subr.mxu1 %v3484_v11 }
 0xab9   :  { %v1199_v9 = vpop.f32.mrb[20].mxu1 }
 0xaba   :  { %v1200_v10 = vadd.f32 %v2894_v8, %v1199_v9  ;;  %v3166_v12 = vpop.f32.mrb[21].mxu1 }
 0xabb   :  { %v1202_v13 = vpop.f32.mrb[22].mxu1 }
 0xabc   :  { %v1206_v14 = vmul.f32 %v1200_v10, %v1200_v10  ;;  %v1203_v15 = vadd.f32 %v2894_v8, %v1202_v13  ;;  %v3167_v16 = vpop.f32.mrb[23].mxu1  ;;  %v2936_v13 = vld [vmem:[%s4146_s8 + $0x1] ss:$0 sm:$0xff] }
 0xabe   :  { %v1208_v17 = vmul.f32 %v1206_v14, %v1200_v10  ;;  %v1207_v18 = vmul.f32 %v1203_v15, %v1203_v15 }
 0xac0   :  { %v1210_v19 = vmul.f32 0.044715, %v1208_v17  ;;  %v1209_v20 = vmul.f32 %v1207_v18, %v1203_v15 }
 0xac2   :  { %v1212_v21 = vadd.f32 %v1210_v19, %v1200_v10  ;;  %v1211_v22 = vmul.f32 0.044715, %v1209_v20 }
 0xac4   :  { %v1214_v24 = vmul.f32 0.7978846, %v1212_v21  ;;  %v1213_v25 = vadd.f32 %v1211_v22, %v1203_v15 }
 0xac6   :  { %3379 = vtanh.f32 %v1214_v24  ;;  %v1215_v26 = vmul.f32 0.7978846, %v1213_v25 }
 0xac8   :  { %3381 = vtanh.f32 %v1215_v26 }
 0xad0   :  { %v3380_v27 = vpop.eup %3379 }
 0xad1   :  { %v1218_v28 = vadd.f32 1.0, %v3380_v27 }
 0xad2   :  { %v3382_v29 = vpop.eup %3381 }
 0xad3   :  { %v1220_v30 = vmul.f32 0.5, %v1218_v28  ;;  %v1219_v31 = vadd.f32 1.0, %v3382_v29 }
 0xad5   :  { %v1221_v32 = vmul.f32 0.5, %v1219_v31  ;;  %v1222_v33 = vmul.f32 %v1220_v30, %v1200_v10 }
 0xad7   :  { %v1223_v34 = vmul.f32 %v1221_v32, %v1203_v15 }
 0xad9   :  { %v2986_v35 = vpack.c.bf16 %v1223_v34, %v1222_v33 }
 0xadb   :  { %3177 = vmatmul.mubr.msk.bf16.vlgmr.msra.gmra.mrb[8].mxu0 %vm1261_vm8, %v2986_v35 }
 0xadc   :  { %3200 = vmatprep.mubr.msk.f32.mxu0 %vm3485_vm5, %v3484_v11 }
 0xbae   :  { %v1299_v37 = vpop.f32.mrb[8].mxu0 }
 0xbaf   :  { %v1300_v38 = vadd.f32 %v2899_v36, %v1299_v37  ;;  %v3178_v39 = vpop.f32.mrb[9].mxu0 }
 0xbb0   :  { %v1302_v40 = vpop.f32.mrb[10].mxu0 }
 0xbb1   :  { %v1303_v41 = vadd.f32 %v2899_v36, %v1302_v40  ;;  %v3179_v42 = vpop.f32.mrb[11].mxu0  ;;  %v1306_v43 = vadd.f32 %v1300_v38, %v1135_v63 }
 0xbb3   :  { %v1308_v44 = vsel %vm209_vm4, %v1306_v43, 0.0  ;;  %v1307_v45 = vadd.f32 %v1303_v41, %v1136_v0  ;;  %v2906_v0 = vld [vmem:[%s4113_s16] ss:$0 sm:$0xff] }
 0xbb4   :  { %1309 = vadd.xlane.f32.xlu0 %v1308_v44 }
 0xbb5   :  { %v1311_v46 = vsel %vm209_vm4, %v1307_v45, 0.0 }
 0xbb6   :  { %1312 = vadd.xlane.f32.xlu1 %v1311_v46 }
 0xc41   :  { %v1310_v47 = vpop.xlane.xlu0 %1309 }
 0xc42   :  { %v1314_v1 = vmul.f32 0.03125, %v1310_v47 }
 0xc43   :  { %v1313_v2 = vpop.xlane.xlu1 %1312 }
 0xc44   :  { %v1316_v48 = vsub.f32 %v1306_v43, %v1314_v1  ;;  %v1315_v49 = vmul.f32 0.03125, %v1313_v2 }
 0xc46   :  { %v1317_v50 = vsub.f32 %v1307_v45, %v1315_v49  ;;  %v1318_v51 = vmul.f32 %v1316_v48, %v1316_v48 }
 0xc48   :  { %v1320_v52 = vsel %vm209_vm4, %v1318_v51, 0.0  ;;  %v1319_v53 = vmul.f32 %v1317_v50, %v1317_v50 }
 0xc49   :  { %1321 = vadd.xlane.f32.xlu0 %v1320_v52 }
 0xc4a   :  { %v1323_v54 = vsel %vm209_vm4, %v1319_v53, 0.0 }
 0xc4b   :  { %1324 = vadd.xlane.f32.xlu1 %v1323_v54 }
 0xcd6   :  { %v1322_v57 = vpop.xlane.xlu0 %1321 }
 0xcd7   :  { %v1326_v58 = vmul.f32 0.03125, %v1322_v57 }
 0xcd8   :  { %v1325_v59 = vpop.xlane.xlu1 %1324 }
 0xcd9   :  { %v1328_v60 = vadd.f32 1e-12, %v1326_v58  ;;  %v1327_v61 = vmul.f32 0.03125, %v1325_v59 }
 0xcdb   :  { %3383 = vrsqrt.f32 %v1328_v60  ;;  %v1329_v62 = vadd.f32 1e-12, %v1327_v61 }
 0xcdd   :  { %3385 = vrsqrt.f32 %v1329_v62 }
 0xce5   :  { %v3384_v63 = vpop.eup %3383 }
 0xce6   :  { %v1332_v3 = vmul.f32 %v3384_v63, %v1316_v48 }
 0xce7   :  { %v3386_v4 = vpop.eup %3385 }
 0xce8   :  { %v1340_v5 = vmul.f32 %v2906_v0, %v1332_v3  ;;  %v1333_v6 = vmul.f32 %v3386_v4, %v1317_v50 }
 0xcea   :  { %v1341_v8 = vmul.f32 %v2906_v0, %v1333_v6  ;;  %v3867_v9 = vadd.f32 %v2907_v7, %v1340_v5 }
 0xcec   :  { %v3869_v10 = vadd.f32 %v2907_v7, %v1341_v8 }
 0xcee   :  { %v2987_v12 = vpack.c.bf16 %v3869_v10, %v3867_v9 }
 0xcf0   :  { %3185 = vmatmul.mubr.msk.bf16.vlgmr.msra.gmra.mrb[24].mxu1 %vm209_vm4, %v2987_v12 }
 0xcf1   :  { %3190 = vmatprep.mubr.msk.f32.mxu1 %vm3485_vm5, %v3484_v11 }
 0xdc3   :  { %v1452_v14 = vpop.f32.mrb[24].mxu1 }
 0xdc4   :  { %v1453_v15 = vadd.f32 %v2936_v13, %v1452_v14  ;;  %v3186_v16 = vpop.f32.mrb[25].mxu1 }
 0xdc5   :  { %v1455_v17 = vpop.f32.mrb[26].mxu1 }
 0xdc6   :  { %v1456_v18 = vadd.f32 %v2936_v13, %v1455_v17  ;;  %1461 = vrot.lane.b32.xlu0 %v1453_v15, %s3486_s6  ;;  %v3187_v19 = vpop.f32.mrb[27].mxu1 }
 0xdc8   :  { %1463 = vrot.lane.b32.xlu1 %v1456_v18, %s3486_s6 }
 0xdca   :  { %1541 = vrot.lane.b32.xlu0 %v1456_v18, %s3487_s27 }
 0xdcc   :  { %1465 = vrot.lane.b32.xlu1 %v1453_v15, %s3487_s27 }
 0xe38   :  { %v3883_v20 = vpop.permute.xlu0 %1461 }
 0xe39   :  { %1617 = vrot.lane.b32.xlu1 %v3883_v20, %s3487_s27 }
 0xe3a   :  { %v3887_v21 = vpop.permute.xlu1 %1463 }
 0xe3b   :  { %1693 = vrot.lane.b32.xlu0 %v3887_v21, %s3487_s27 }
 0xe3c   :  { %v1542_v24 = vpop.permute.xlu0 %1541 }
 0xe3e   :  { %v1466_v22 = vpop.permute.xlu1 %1465 }
 0xe3f   :  { %3189 = vmatpush3.xpose.msk.msra.mxu1 %vm358_vm6, %v1466_v22 }
 0xe40   :  { %3193 = vmatprep.subr.mxu1 %v3484_v11 }
 0xe42   :  { %3191 = vmatmul.mubr.msk.f32.vlgmr.msra.gmra.mrb[18].mxu1 %vm358_vm6, %v1453_v15 }
 0xe43   :  { %3194 = vmatpush3.xpose.msk.msra.mxu1 %vm358_vm6, %v1542_v24  ;;  %3195 = vmatprep.mubr.msk.f32.mxu1 %vm3485_vm5, %v3484_v11  ;;  %v3339_v24 = vld [vmem:[%s4147_s0 + $0x18] sm:$0xff]  }
 0xe44   :  { %3203 = vmatprep.subr.mxu1 %v3484_v11 }
 0xe46   :  { %3196 = vmatmul.mubr.msk.f32.vlgmr.msra.gmra.mrb[28].mxu1 %vm358_vm6, %v1456_v18 }
 0xe47   :  { %3205 = vmatprep.mubr.msk.f32.mxu1 %vm3485_vm5, %v3484_v11 }
 0xeab   :  { %v1618_v25 = vpop.permute.xlu1 %1617 }
 0xeac   :  { %3199 = vmatpush3.xpose.msk.msra.mxu0 %vm358_vm6, %v1618_v25 }
 0xead   :  { %v1694_v26 = vpop.permute.xlu0 %1693  ;;  %3208 = vmatprep.subr.mxu0 %v3484_v11 }
 0xeae   :  { %3204 = vmatpush3.xpose.msk.msra.mxu1 %vm358_vm6, %v1694_v26 }
 0xeaf   :  { %3201 = vmatmul.mubr.msk.f32.vlgmr.msra.gmra.mrb[12].mxu0 %vm358_vm6, %v3883_v20  ;;  %3213 = vmatprep.subr.mxu1 %v3484_v11 }
 0xeb0   :  { %3210 = vmatprep.mubr.msk.f32.mxu0 %vm3485_vm5, %v3484_v11 }
 0xeb1   :  { %3206 = vmatmul.mubr.msk.f32.vlgmr.msra.gmra.mrb[30].mxu1 %vm358_vm6, %v3887_v21 }
 0xeb2   :  { %3215 = vmatprep.mubr.msk.f32.mxu1 %vm3485_vm5, %v3484_v11 }
 0xf15   :  { %v1537_v27 = vpop.f32.mrb[18].mxu1 }
 0xf16   :  { %v1769_v28 = vmul.f32 0.25, %v1537_v27  ;;  %v3192_v29 = vpop.f32.mrb[19].mxu1 }
 0xf18   :  { %v1773_v30 = vsel %vm665_vm7, %v1769_v28, -inf }
 0xf19   :  { %1774 = vmax.xlane.f32.xlu1 %v1773_v30  ;;  %v1613_v31 = vpop.f32.mrb[28].mxu1 }
 0xf1a   :  { %v1770_v32 = vmul.f32 0.25, %v1613_v31  ;;  %v3197_v33 = vpop.f32.mrb[29].mxu1 }
 0xf1c   :  { %v1776_v34 = vsel %vm665_vm7, %v1770_v32, -inf }
 0xf1d   :  { %1777 = vmax.xlane.f32.xlu0 %v1776_v34 }
 0xf82   :  { %v1689_v35 = vpop.f32.mrb[12].mxu0 }
 0xf83   :  { %v1771_v36 = vmul.f32 0.25, %v1689_v35  ;;  %v3202_v37 = vpop.f32.mrb[13].mxu0 }
 0xf84   :  { %v1765_v38 = vpop.f32.mrb[30].mxu1 }
 0xf85   :  { %v1772_v39 = vmul.f32 0.25, %v1765_v38  ;;  %v3207_v40 = vpop.f32.mrb[31].mxu1  ;;  %v1779_v41 = vsel %vm665_vm7, %v1771_v36, -inf }
 0xf86   :  { %1780 = vmax.xlane.f32.xlu0 %v1779_v41 }
 0xf87   :  { %v1782_v42 = vsel %vm665_vm7, %v1772_v39, -inf }
 0xf88   :  { %1783 = vmax.xlane.f32.xlu1 %v1782_v42 }
 0xf99   :  { %1893 = vrot.lane.b32.xlu1 %v1456_v18, %s3488_s4  ;;  %v3338_v18 = vld [vmem:[%s4147_s0 + $0x10] sm:$0xff]  }
 0xf9c   :  { %1817 = vrot.lane.b32.xlu0 %v1453_v15, %s3488_s4 }
 0xfa6   :  { %v1775_v43 = vpop.xlane.xlu1 %1774 }
 0xfa7   :  { %v1785_v44 = vsub.f32 %v1769_v28, %v1775_v43 }
 0xfa9   :  { %v1789_v45 = vmul.f32 1.442695, %v1785_v44 }
 0xfaa   :  { %v1778_v46 = vpop.xlane.xlu0 %1777 }
 0xfab   :  { %v1786_v47 = vsub.f32 %v1770_v32, %v1778_v46  ;;  %3387 = vpow2.f32 %v1789_v45 }
 0xfad   :  { %v1791_v1 = vmul.f32 1.442695, %v1786_v47 }
 0xfaf   :  { %3389 = vpow2.f32 %v1791_v1 }
 0xfb5   :  { %v3388_v2 = vpop.eup %3387 }
 0xfb6   :  { %v1797_v49 = vsel %vm665_vm7, %v3388_v2, 0.0 }
 0xfb9   :  { %v3390_v48 = vpop.eup %3389 }
 0xfba   :  { %v1800_v50 = vsel %vm665_vm7, %v3390_v48, 0.0 }
 0xfbb   :  { %1798 = vadd.xlane.f32.xlu0 %v1797_v49 }
 0xfbd   :  { %1801 = vadd.xlane.f32.xlu1 %v1800_v50 }
0x1013   :  { %v1781_v51 = vpop.xlane.xlu0 %1780 }
0x1014   :  { %v1787_v52 = vsub.f32 %v1771_v36, %v1781_v51  ;;  %v2953_v36 = vld [vmem:[%s4148_s26 + $0x1] ss:$0 sm:$0xff]  ;;  %s2847_s26 = sshll.u32 %s3492_s9, 4  ;;  %s2848_s26 = int_to_ptr.vmem [resolvable:$true] %s2847_s26 }
0x1015   :  { %v1784_v53 = vpop.xlane.xlu1 %1783 }
0x1016   :  { %v1793_v54 = vmul.f32 1.442695, %v1787_v52  ;;  %v1788_v55 = vsub.f32 %v1772_v39, %v1784_v53 }
0x1017   :  { %v1818_v56 = vpop.permute.xlu0 %1817 }
0x1018   :  { %3391 = vpow2.f32 %v1793_v54  ;;  %v1795_v57 = vmul.f32 1.442695, %v1788_v55  ;;  %3209 = vmatpush3.msra.mxu0 %v1818_v56  ;;  %v3341_v54 = vld [vmem:[%s4109_s12 + $0x18] sm:$0xff]  }
0x1019   :  { %v1894_v58 = vpop.permute.xlu1 %1893  ;;  %3218 = vmatprep.subr.mxu0 %v3484_v11 }
0x101a   :  { %3393 = vpow2.f32 %v1795_v57  ;;  %3214 = vmatpush3.msra.mxu1 %v1894_v58 }
0x101b   :  { %3223 = vmatprep.subr.mxu1 %v3484_v11 }
0x1022   :  { %v3392_v59 = vpop.eup %3391 }
0x1023   :  { %v1803_v60 = vsel %vm665_vm7, %v3392_v59, 0.0 }
0x1024   :  { %v3394_v61 = vpop.eup %3393  ;;  %1804 = vadd.xlane.f32.xlu0 %v1803_v60 }
0x1025   :  { %v1806_v62 = vsel %vm665_vm7, %v3394_v61, 0.0 }
0x1026   :  { %1807 = vadd.xlane.f32.xlu1 %v1806_v62 }
0x1037   :  { %1969 = vrot.lane.b32.xlu1 %v3883_v20, %s3488_s4 }
0x103a   :  { %2045 = vrot.lane.b32.xlu0 %v3887_v21, %s3488_s4 }
0x1048   :  { %v1799_v63 = vpop.xlane.xlu0 %1798 }
0x1049   :  { %3395 = vrcp.f32 %v1799_v63  ;;  %v2958_v63 = vld [vmem:[%s4107_s10 + $0x1] ss:$0 sm:$0xff] }
0x104a   :  { %v1802_v0 = vpop.xlane.xlu1 %1801 }
0x104b   :  { %3397 = vrcp.f32 %v1802_v0 }
0x1053   :  { %v3396_v3 = vpop.eup %3395 }
0x1054   :  { %v1810_v4 = vmul.f32 %v3396_v3, %v3388_v2 }
0x1055   :  { %v3398_v5 = vpop.eup %3397 }
0x1056   :  { %v1812_v6 = vmul.f32 %v3398_v5, %v3390_v48  ;;  %3211 = vmatmul.mubr.msk.f32.vlgmr.msra.gmra.mrb[14].mxu0 %vm665_vm7, %v1810_v4  ;;  %v2959_v5 = vld [vmem:[%s4108_s11 + $0x1] ss:$0 sm:$0xff] }
0x1057   :  { %3220 = vmatprep.mubr.msk.f32.mxu0 %vm3485_vm5, %v3484_v11 }
0x1058   :  { %3216 = vmatmul.mubr.msk.f32.vlgmr.msra.gmra.mrb[32].mxu1 %vm665_vm7, %v1812_v6 }
0x1059   :  { %3225 = vmatprep.mubr.msk.f32.mxu1 %vm3485_vm5, %v3484_v11 }
0x10b1   :  { %v1805_v7 = vpop.xlane.xlu0 %1804 }
0x10b2   :  { %3399 = vrcp.f32 %v1805_v7 }
0x10b3   :  { %v1808_v8 = vpop.xlane.xlu1 %1807 }
0x10b4   :  { %3401 = vrcp.f32 %v1808_v8 }
0x10b5   :  { %v2046_v12 = vpop.permute.xlu0 %2045 }
0x10b6   :  { %3224 = vmatpush3.msra.mxu1 %v2046_v12 }
0x10b7   :  { %v1970_v13 = vpop.permute.xlu1 %1969  ;;  %3236 = vmatprep.subr.bf16.mxu1 %v3484_v11 }
0x10b8   :  { %3219 = vmatpush3.msra.mxu0 %v1970_v13  ;;  %v3342_v13 = vld [vmem:[%s4111_s14 + $0x20] sm:$0xff]  }
0x10b9   :  { %3228 = vmatprep.subr.bf16.mxu0 %v3484_v11 }
0x10bc   :  { %v3400_v14 = vpop.eup %3399 }
0x10bd   :  { %v1814_v15 = vmul.f32 %v3400_v14, %v3392_v59  ;;  %v3343_v14 = vld [vmem:[%s4111_s14 + $0x28] sm:$0xff]  }
0x10be   :  { %v3402_v16 = vpop.eup %3401 }
0x10bf   :  { %v1816_v17 = vmul.f32 %v3402_v16, %v3394_v61  ;;  %3221 = vmatmul.mubr.msk.f32.vlgmr.msra.gmra.mrb[16].mxu0 %vm665_vm7, %v1814_v15  ;;  %v3344_v15 = vld [vmem:[%s4111_s14 + $0x30] sm:$0xff]   ;;  %v3345_v16 = vld [vmem:[%s4111_s14 + $0x38] sm:$0xff]  }
0x10c0   :  { %3232 = vmatprep.mubr.msk.bf16.mxu0 %vm3485_vm5, %v3484_v11  ;;  %3229 = vmatpush3.bf16.msra.mxu0 %v3338_v18 }
0x10c1   :  { %3226 = vmatmul.mubr.msk.f32.vlgmr.msra.gmra.mrb[34].mxu1 %vm665_vm7, %v1816_v17  ;;  %3230 = vmatprep.subr.bf16.mxu0 %v3484_v11  ;;  %v2960_v17 = vld [vmem:[%s4110_s13 + $0x1] ss:$0 sm:$0xff] }
0x10c2   :  { %3240 = vmatprep.mubr.msk.bf16.mxu1 %vm3485_vm5, %v3484_v11 }
0x10c4   :  { %3231 = vmatpush3.bf16.msra.mxu0 %v3339_v24 }
0x10c5   :  { %3244 = vmatprep.subr.bf16.mxu0 %v3484_v11 }
0x1129   :  { %v1889_v19 = vpop.f32.mrb[14].mxu0 }
0x112a   :  { %v3212_v20 = vpop.f32.mrb[15].mxu0 }
0x112b   :  { %v1965_v21 = vpop.f32.mrb[32].mxu1 }
0x112c   :  { %v3217_v22 = vpop.f32.mrb[33].mxu1 }
0x1192   :  { %v2041_v25 = vpop.f32.mrb[16].mxu0 }
0x1193   :  { %v3222_v26 = vpop.f32.mrb[17].mxu0 }
0x1194   :  { %v2117_v27 = vpop.f32.mrb[34].mxu1 }
0x1195   :  { %v3321_v28 = vpack.i.bf16 %v2117_v27, %v2041_v25  ;;  %v3227_v29 = vpop.f32.mrb[35].mxu1 }
0x1197   :  { %3322 = vrot.lane.b32.xlu1 %v3321_v28, %s3489_s30 }
0x1209   :  { %v3323_v30 = vpop.permute.xlu1 %3322 }
0x120a   :  { %v3325_v31 = vunpack.i.h.bf16 %v3323_v30  ;;  %v3324_v32 = vunpack.i.l.bf16 %v3323_v30 }
0x120c   :  { %v2130_v33 = vsel %vm358_vm6, %v1965_v21, %v3325_v31  ;;  %v2129_v34 = vsel %vm358_vm6, %v1889_v19, %v3324_v32 }
0x120d   :  { %v2988_v35 = vpack.c.bf16 %v2130_v33, %v2129_v34 }
0x120f   :  { %3233 = vmatmul.mubr.msk.bf16.vlgmr.msra.gmra.mrb[20].mxu0 %vm209_vm4, %v2988_v35 }
0x1210   :  { %3252 = vmatprep.mubr.msk.bf16.mxu0 %vm3485_vm5, %v3484_v11  ;;  %3245 = vmatpush3.bf16.msra.mxu0 %v3342_v13 }
0x1211   :  { %3246 = vmatprep.subr.bf16.mxu0 %v3484_v11 }
0x1214   :  { %3247 = vmatpush3.bf16.msra.mxu0 %v3343_v14  ;;  %v2973_v14 = vld [vmem:[%s4114_s17 + $0x1] ss:$0 sm:$0xff] }
0x1215   :  { %3248 = vmatprep.subr.bf16.mxu0 %v3484_v11 }
0x1218   :  { %3249 = vmatpush3.bf16.msra.mxu0 %v3344_v15 }
0x1219   :  { %3250 = vmatprep.subr.bf16.mxu0 %v3484_v11 }
0x121c   :  { %3251 = vmatpush3.bf16.msra.mxu0 %v3345_v16 }
0x121d   :  { %3272 = vmatprep.subr.bf16.mxu0 %v3484_v11 }
0x12e2   :  { %v2193_v37 = vpop.f32.mrb[20].mxu0 }
0x12e3   :  { %v2194_v38 = vadd.f32 %v2953_v36, %v2193_v37  ;;  %v3234_v39 = vpop.f32.mrb[21].mxu0 }
0x12e4   :  { %v2196_v40 = vpop.f32.mrb[22].mxu0 }
0x12e5   :  { %v2197_v41 = vadd.f32 %v2953_v36, %v2196_v40  ;;  %v3235_v42 = vpop.f32.mrb[23].mxu0  ;;  %v2200_v43 = vadd.f32 %v2194_v38, %v3867_v9 }
0x12e7   :  { %v2202_v44 = vsel %vm209_vm4, %v2200_v43, 0.0  ;;  %v2201_v45 = vadd.f32 %v2197_v41, %v3869_v10  ;;  %v3340_v10 = vld [vmem:[%s4109_s12 + $0x10] sm:$0xff]  }
0x12e8   :  { %2203 = vadd.xlane.f32.xlu0 %v2202_v44  ;;  %3237 = vmatpush3.bf16.msra.mxu1 %v3340_v10  ;;  %v2965_v44 = vld [vmem:[%s4112_s15 + $0x1] ss:$0 sm:$0xff] }
0x12e9   :  { %v2205_v46 = vsel %vm209_vm4, %v2201_v45, 0.0  ;;  %3238 = vmatprep.subr.bf16.mxu1 %v3484_v11 }
0x12ea   :  { %2206 = vadd.xlane.f32.xlu1 %v2205_v46 }
0x12ec   :  { %3239 = vmatpush3.bf16.msra.mxu1 %v3341_v54 }
0x12ed   :  { %3256 = vmatprep.subr.bf16.mxu1 %v3484_v11 }
0x1375   :  { %v2204_v47 = vpop.xlane.xlu0 %2203 }
0x1376   :  { %v2208_v1 = vmul.f32 0.03125, %v2204_v47 }
0x1377   :  { %v2207_v2 = vpop.xlane.xlu1 %2206 }
0x1378   :  { %v2210_v48 = vsub.f32 %v2200_v43, %v2208_v1  ;;  %v2209_v49 = vmul.f32 0.03125, %v2207_v2 }
0x137a   :  { %v2211_v50 = vsub.f32 %v2201_v45, %v2209_v49  ;;  %v2212_v51 = vmul.f32 %v2210_v48, %v2210_v48 }
0x137c   :  { %v2214_v52 = vsel %vm209_vm4, %v2212_v51, 0.0  ;;  %v2213_v53 = vmul.f32 %v2211_v50, %v2211_v50 }
0x137d   :  { %2215 = vadd.xlane.f32.xlu0 %v2214_v52 }
0x137e   :  { %v2217_v9 = vsel %vm209_vm4, %v2213_v53, 0.0 }
0x1381   :  { %2218 = vadd.xlane.f32.xlu0 %v2217_v9 }
0x140a   :  { %v2216_v55 = vpop.xlane.xlu0 %2215 }
0x140b   :  { %v2220_v56 = vmul.f32 0.03125, %v2216_v55 }
0x140d   :  { %v2222_v57 = vadd.f32 1e-12, %v2220_v56 }
0x140e   :  { %v2219_v58 = vpop.xlane.xlu0 %2218 }
0x140f   :  { %3403 = vrsqrt.f32 %v2222_v57  ;;  %v2221_v59 = vmul.f32 0.03125, %v2219_v58 }
0x1411   :  { %v2223_v60 = vadd.f32 1e-12, %v2221_v59 }
0x1413   :  { %3405 = vrsqrt.f32 %v2223_v60 }
0x1419   :  { %v3404_v61 = vpop.eup %3403 }
0x141a   :  { %v2226_v62 = vmul.f32 %v3404_v61, %v2210_v48  ;;  %v3346_v61 = vld [vmem:[%s4115_s18] sm:$0xff]  }
0x141c   :  { %v2234_v3 = vmul.f32 %v2958_v63, %v2226_v62  ;;  %v3347_v62 = vld [vmem:[%s4115_s18 + $0x8] sm:$0xff]  }
0x141d   :  { %v3406_v0 = vpop.eup %3405 }
0x141e   :  { %v2227_v4 = vmul.f32 %v3406_v0, %v2211_v50  ;;  %v2242_v7 = vadd.f32 %v2959_v5, %v2234_v3 }
0x1420   :  { %v2235_v6 = vmul.f32 %v2958_v63, %v2227_v4 }
0x1422   :  { %v2243_v8 = vadd.f32 %v2959_v5, %v2235_v6 }
0x1424   :  { %v2989_v12 = vpack.c.bf16 %v2243_v8, %v2242_v7 }
0x1426   :  { %3241 = vmatmul.mubr.msk.bf16.vlgmr.msra.gmra.mrb[36].mxu1 %vm209_vm4, %v2989_v12 }
0x1427   :  { %3260 = vmatprep.mubr.msk.bf16.mxu1 %vm3485_vm5, %v3484_v11  ;;  %3257 = vmatpush3.bf16.msra.mxu1 %v3346_v61 }
0x1428   :  { %3258 = vmatprep.subr.bf16.mxu1 %v3484_v11 }
0x142b   :  { %3259 = vmatpush3.bf16.msra.mxu1 %v3347_v62 }
0x142c   :  { %3264 = vmatprep.subr.bf16.mxu1 %v3484_v11 }
0x14f9   :  { %v2306_v18 = vpop.f32.mrb[36].mxu1 }
0x14fa   :  { %v2307_v19 = vadd.f32 %v2960_v17, %v2306_v18  ;;  %v3242_v20 = vpop.f32.mrb[37].mxu1 }
0x14fb   :  { %v2309_v21 = vpop.f32.mrb[38].mxu1 }
0x14fc   :  { %v2313_v22 = vmul.f32 %v2307_v19, %v2307_v19  ;;  %v2310_v24 = vadd.f32 %v2960_v17, %v2309_v21  ;;  %v3243_v25 = vpop.f32.mrb[39].mxu1 }
0x14fe   :  { %v2315_v26 = vmul.f32 %v2313_v22, %v2307_v19  ;;  %v2314_v27 = vmul.f32 %v2310_v24, %v2310_v24 }
0x1500   :  { %v2317_v28 = vmul.f32 0.044715, %v2315_v26  ;;  %v2316_v29 = vmul.f32 %v2314_v27, %v2310_v24 }
0x1502   :  { %v2319_v30 = vadd.f32 %v2317_v28, %v2307_v19  ;;  %v2318_v31 = vmul.f32 0.044715, %v2316_v29  ;;  %v3349_v28 = vld [vmem:[%s4117_s20] sm:$0xff]  }
0x1503   :  { %v3350_v29 = vld [vmem:[%s4119_s22] sm:$0xff]  }
0x1504   :  { %v2321_v32 = vmul.f32 0.7978846, %v2319_v30  ;;  %v2320_v33 = vadd.f32 %v2318_v31, %v2310_v24  ;;  %v3351_v30 = vld [vmem:[%s4117_s20 + $0x8] sm:$0xff]  }
0x1505   :  { %v3352_v31 = vld [vmem:[%s4119_s22 + $0x8] sm:$0xff]  }
0x1506   :  { %3407 = vtanh.f32 %v2321_v32  ;;  %v2322_v34 = vmul.f32 0.7978846, %v2320_v33  ;;  %v3490_v32 = vmov 1966171168  }
0x1507   :  { %v2486_v33 = vunpack.c.l.s4 %v3490_v32 }
0x1508   :  { %3409 = vtanh.f32 %v2322_v34 }
0x1509   :  { %v2487_v34 = vunpack.c.0.s8 %v2486_v33 }
0x1510   :  { %v3408_v35 = vpop.eup %3407 }
0x1511   :  { %v2325_v36 = vadd.f32 1.0, %v3408_v35  ;;  %v2489_v35 = vshrl.u32 %v84_v23, 7 }
0x1512   :  { %v3410_v37 = vpop.eup %3409 }
0x1513   :  { %v2327_v38 = vmul.f32 0.5, %v2325_v36  ;;  %v2326_v39 = vadd.f32 1.0, %v3410_v37  ;;  %v2490_v36 = vsub.s32 %v2487_v34, %v2489_v35 }
0x1515   :  { %v2328_v40 = vmul.f32 0.5, %v2326_v39  ;;  %v2329_v41 = vmul.f32 %v2327_v38, %v2307_v19 }
0x1517   :  { %v2330_v42 = vmul.f32 %v2328_v40, %v2310_v24 }
0x1519   :  { %v2990_v43 = vpack.c.bf16 %v2330_v42, %v2329_v41 }
0x151b   :  { %3253 = vmatmul.mubr.msk.bf16.vlgmr.msra.gmra.mrb[24].mxu0 %vm1261_vm8, %v2990_v43 }
0x151c   :  { %3276 = vmatprep.mubr.msk.bf16.mxu0 %vm3485_vm5, %v3484_v11  ;;  %3273 = vmatpush3.bf16.msra.mxu0 %v3350_v29 }
0x151d   :  { %3274 = vmatprep.subr.bf16.mxu0 %v3484_v11 }
0x1520   :  { %3275 = vmatpush3.bf16.msra.mxu0 %v3352_v31 }
0x15ee   :  { %v2405_v45 = vpop.f32.mrb[24].mxu0 }
0x15ef   :  { %v2406_v46 = vadd.f32 %v2965_v44, %v2405_v45  ;;  %v3254_v47 = vpop.f32.mrb[25].mxu0 }
0x15f0   :  { %v2408_v1 = vpop.f32.mrb[26].mxu0 }
0x15f1   :  { %v2409_v2 = vadd.f32 %v2965_v44, %v2408_v1  ;;  %v3255_v48 = vpop.f32.mrb[27].mxu0  ;;  %v2412_v49 = vadd.f32 %v2406_v46, %v2242_v7 }
0x15f3   :  { %v2414_v50 = vsel %vm209_vm4, %v2412_v49, 0.0  ;;  %v2413_v51 = vadd.f32 %v2409_v2, %v2243_v8  ;;  %v2972_v8 = vld [vmem:[%s4113_s16 + $0x1] ss:$0 sm:$0xff] }
0x15f4   :  { %2415 = vadd.xlane.f32.xlu0 %v2414_v50 }
0x15f5   :  { %v2417_v52 = vsel %vm209_vm4, %v2413_v51, 0.0 }
0x15f6   :  { %2418 = vadd.xlane.f32.xlu1 %v2417_v52 }
0x1681   :  { %v2416_v53 = vpop.xlane.xlu0 %2415 }
0x1682   :  { %v2420_v9 = vmul.f32 0.03125, %v2416_v53 }
0x1683   :  { %v2419_v10 = vpop.xlane.xlu1 %2418 }
0x1684   :  { %v2422_v54 = vsub.f32 %v2412_v49, %v2420_v9  ;;  %v2421_v55 = vmul.f32 0.03125, %v2419_v10  ;;  %v3353_v9 = vld [vmem:[%s4118_s21] ss:$0 sps:$4 sm:$0x11]   ;;  %s3491_s21 = smov [#allocation2]  }
0x1685   :  { %v3354_v10 = vld [vmem:[%s4120_s23] ss:$0 sps:$4 sm:$0x11]   ;;  %s2835_s23 = sshll.u32 %s3491_s21, 4  ;;  %s2836_s23 = int_to_ptr.vmem [resolvable:$true] %s2835_s23 }
0x1686   :  { %v2423_v56 = vsub.f32 %v2413_v51, %v2421_v55  ;;  %v2424_v57 = vmul.f32 %v2422_v54, %v2422_v54  ;;  %v2706_v55 = vrot.slane %v3354_v10, %v2490_v36  ;;  %s3435_s13 = scalar_lea.vmem %s2836_s23, 32  ;;  %p3440_p1 = scmp.lt.s32.totalorder %s2836_s23, %s2836_s23 }
0x1687   :  { %p3436_p0 = scmp.ne.s32.totalorder %s2836_s23, %s3435_s13  ;;  %p3441_p2 = scmp.lt.s32.totalorder %s3435_s13, %s3435_s13 }
0x1688   :  { %v2426_v58 = vsel %vm209_vm4, %v2424_v57, 0.0  ;;  %v2425_v59 = vmul.f32 %v2423_v56, %v2423_v56  ;;  %v2713_v57 = vrot.slane %v2706_v55, %v2490_v36 }
0x1689   :  { %2427 = vadd.xlane.f32.xlu0 %v2426_v58  ;;  %p3442_p3 = por %p3441_p2, %p3440_p1 }
0x168a   :  { %v2429_v60 = vsel %vm209_vm4, %v2425_v59, 0.0 }
0x168b   :  { %2430 = vadd.xlane.f32.xlu1 %v2429_v60  ;;  %p3443_p4 = pnand %p3442_p3, %p3436_p0 }
0x1716   :  { %v2428_v63 = vpop.xlane.xlu0 %2427 }
0x1717   :  { %v2432_v0 = vmul.f32 0.03125, %v2428_v63 }
0x1718   :  { %v2431_v3 = vpop.xlane.xlu1 %2430 }
0x1719   :  { %v2434_v4 = vadd.f32 1e-12, %v2432_v0  ;;  %v2433_v5 = vmul.f32 0.03125, %v2431_v3 }
0x171b   :  { %3411 = vrsqrt.f32 %v2434_v4  ;;  %v2435_v6 = vadd.f32 1e-12, %v2433_v5 }
0x171d   :  { %3413 = vrsqrt.f32 %v2435_v6 }
0x1725   :  { %v3412_v7 = vpop.eup %3411 }
0x1726   :  { %v2438_v12 = vmul.f32 %v3412_v7, %v2422_v54  ;;  %v2604_v54 = vrot.slane %v3353_v9, %v2490_v36 }
0x1727   :  { %v3414_v13 = vpop.eup %3413 }
0x1728   :  { %v2446_v15 = vmul.f32 %v2972_v8, %v2438_v12  ;;  %v2439_v16 = vmul.f32 %v3414_v13, %v2423_v56  ;;  %v2611_v56 = vrot.slane %v2604_v54, %v2490_v36 }
0x172a   :  { %v2454_v17 = vadd.f32 %v2973_v14, %v2446_v15  ;;  %v2447_v18 = vmul.f32 %v2972_v8, %v2439_v16 }
0x172c   :  { %v2455_v19 = vadd.f32 %v2973_v14, %v2447_v18  ;;  %v2456_v20 = vpack.c.bf16 %v2454_v17, %v2454_v17 }
0x172e   :  { %v2457_v21 = vpack.c.bf16 %v2455_v19, %v2455_v19  ;;  %v2465_v24 = vunpack.c.l.b16 %v2456_v20 }
0x1730   :  { %v2466_v22 = vunpack.c.l.b16 %v2457_v21 }
0x1732   :  { %v2467_v25 = vrot.slane %v2466_v22, 7 }
0x1734   :  { %v2469_v26 = vsel %vm2468_vm9, %v2467_v25, %v2465_v24 }
0x1735   :  { %v2470_v27 = vpack.c.b16 %v2469_v26, %v2469_v26 }
0x1737   :  { %3261 = vmatmul.mubr.msk.bf16.vlgmr.msra.gmra.mrb[40].mxu1 %vm209_vm4, %v2470_v27 }
0x1738   :  { %3268 = vmatprep.mubr.msk.bf16.mxu1 %vm3485_vm5, %v3484_v11  ;;  %3265 = vmatpush3.bf16.msra.mxu1 %v3349_v28 }
0x1739   :  { %3266 = vmatprep.subr.bf16.mxu1 %v3484_v11  ;;  %v3348_v11 = vld [vmem:[%s4116_s19] ss:$0 sps:$4 sm:$0x11]  }
0x173a   :  { %v2491_v37 = vrot.slane %v3348_v11, %v2490_v36 }
0x173c   :  { %3267 = vmatpush3.bf16.msra.mxu1 %v3351_v30  ;;  %v2498_v38 = vrot.slane %v2491_v37, %v2490_v36 }
0x180a   :  { %v2537_v39 = vpop.f32.mrb[40].mxu1 }
0x180b   :  { %v2538_v40 = vadd.f32 %v2537_v39, %v2498_v38  ;;  %v3262_v41 = vpop.f32.mrb[41].mxu1 }
0x180c   :  { %v2540_v42 = vpop.f32.mrb[42].mxu1 }
0x180d   :  { %v2550_v43 = vrot.slane %v2538_v40, %v2490_v36  ;;  %v3263_v44 = vpop.f32.mrb[43].mxu1 }
0x180f   :  { %v2551_v45 = vcombine.high %v2550_v43, %v2550_v43  ;;  %v2558_v46 = vrot.slane %v2550_v43, %v2490_v36 }
0x1811   :  { %v2565_v47 = vrot.slane %v2551_v45, %v2490_v36  ;;  %3415 = vtanh.f32 %v2558_v46 }
0x1813   :  { %3417 = vtanh.f32 %v2565_v47 }
0x181b   :  { %v3416_v1 = vpop.eup %3415 }
0x181c   :  { %v2570_v2 = vpack.c.bf16 %v3416_v1, %v3416_v1 }
0x181d   :  { %v3418_v23 = vpop.eup %3417 }
0x181e   :  { %v2571_v48 = vpack.c.bf16 %v3418_v23, %v3418_v23  ;;  %v2579_v50 = vunpack.c.l.b16 %v2570_v2 }
0x1820   :  { %v2580_v49 = vunpack.c.l.b16 %v2571_v48 }
0x1822   :  { %v2581_v51 = vrot.slane %v2580_v49, 7 }
0x1824   :  { %v2582_v52 = vsel %vm2468_vm9, %v2581_v51, %v2579_v50 }
0x1825   :  { %v2583_v53 = vpack.c.b16 %v2582_v52, %v2582_v52 }
0x1827   :  { %3269 = vmatmul.mubr.msk.bf16.vlgmr.msra.gmra.mrb[44].mxu1 %vm209_vm4, %v2583_v53  ;;  %3277 = vmatmul.mubr.msk.bf16.vlgmr.msra.gmra.mrb[28].mxu0 %vm209_vm4, %v2583_v53 }
0x18fa   :  { %v2650_v58 = vpop.f32.mrb[44].mxu1  ;;  %v2749_v59 = vpop.f32.mrb[28].mxu0 }
0x18fb   :  { %v2651_v60 = vadd.f32 %v2650_v58, %v2611_v56  ;;  %v2750_v61 = vadd.f32 %v2749_v59, %v2713_v57  ;;  %v3270_v62 = vpop.f32.mrb[45].mxu1  ;;  %v3278_v63 = vpop.f32.mrb[29].mxu0 }
0x18fc   :  { %v2653_v0 = vpop.f32.mrb[46].mxu1  ;;  %v2752_v3 = vpop.f32.mrb[30].mxu0 }
0x18fd   :  { %v2663_v4 = vrot.slane %v2651_v60, %v2490_v36  ;;  %v2762_v5 = vrot.slane %v2750_v61, %v2490_v36  ;;  %v3271_v6 = vpop.f32.mrb[47].mxu1  ;;  %v3279_v7 = vpop.f32.mrb[31].mxu0 }
0x18ff   :  { %v2671_v8 = vrot.slane %v2663_v4, %v2490_v36  ;;  %v2664_v12 = vcombine.high %v2663_v4, %v2663_v4  ;;  %v2763_v13 = vcombine.high %v2762_v5, %v2762_v5  ;;  %v2770_v16 = vrot.slane %v2762_v5, %v2490_v36 }
0x1901   :  { %v2781_v14 = vsel %vm2780_vm10, %v2671_v8, -inf  ;;  %v2678_v15 = vrot.slane %v2664_v12, %v2490_v36  ;;  %v2777_v18 = vrot.slane %v2763_v13, %v2490_v36  ;;  %v2806_v19 = vsel %vm2805_vm11, %v2770_v16, -inf }
0x1902   :  { %2782 = vmax.xlane.f32.xlu1 %v2781_v14 }
0x1903   :  { %v2784_v17 = vsel %vm2780_vm10, %v2678_v15, -inf  ;;  %v2809_v20 = vsel %vm2805_vm11, %v2777_v18, -inf }
0x1904   :  { %2785 = vmax.xlane.f32.xlu0 %v2784_v17 }
0x1906   :  { %2807 = vmax.xlane.f32.xlu1 %v2806_v19 }
0x1908   :  { %2810 = vmax.xlane.f32.xlu0 %v2809_v20 }
0x198f   :  { %v2783_v21 = vpop.xlane.xlu1 %2782 }
0x1990   :  { %v2787_v22 = vsub.f32 %v2671_v8, %v2783_v21 }
0x1991   :  { %v2786_v24 = vpop.xlane.xlu0 %2785 }
0x1992   :  { %v2789_v25 = vmul.f32 1.442695, %v2787_v22  ;;  %v2788_v26 = vsub.f32 %v2678_v15, %v2786_v24 }
0x1993   :  { %v2808_v27 = vpop.xlane.xlu1 %2807 }
0x1994   :  { %3419 = vpow2.f32 %v2789_v25  ;;  %v2791_v28 = vmul.f32 1.442695, %v2788_v26  ;;  %v2812_v29 = vsub.f32 %v2770_v16, %v2808_v27 }
0x1995   :  { %v2811_v30 = vpop.xlane.xlu0 %2810 }
0x1996   :  { %3421 = vpow2.f32 %v2791_v28  ;;  %v2814_v31 = vmul.f32 1.442695, %v2812_v29  ;;  %v2813_v32 = vsub.f32 %v2777_v18, %v2811_v30 }
0x1998   :  { %3423 = vpow2.f32 %v2814_v31  ;;  %v2816_v33 = vmul.f32 1.442695, %v2813_v32 }
0x199a   :  { %3425 = vpow2.f32 %v2816_v33 }
0x199e   :  { %v3420_v34 = vpop.eup %3419 }
0x199f   :  { %v2793_v35 = vsel %vm2780_vm10, %v3420_v34, 0.0 }
0x19a0   :  { %v3422_v36 = vpop.eup %3421  ;;  %2794 = vadd.xlane.f32.xlu1 %v2793_v35 }
0x19a1   :  { %v2796_v11 = vsel %vm2780_vm10, %v3422_v36, 0.0 }
0x19a2   :  { %v3424_v37 = vpop.eup %3423  ;;  %2797 = vadd.xlane.f32.xlu0 %v2796_v11 }
0x19a3   :  { %v2818_v38 = vsel %vm2805_vm11, %v3424_v37, 0.0 }
0x19a4   :  { %v3426_v39 = vpop.eup %3425  ;;  %2819 = vadd.xlane.f32.xlu1 %v2818_v38 }
0x19a5   :  { %v2821_v40 = vsel %vm2805_vm11, %v3426_v39, 0.0 }
0x19a6   :  { %2822 = vadd.xlane.f32.xlu0 %v2821_v40 }
0x1a2d   :  { %v2795_v41 = vpop.xlane.xlu1 %2794 }
0x1a2e   :  { %3427 = vrcp.f32 %v2795_v41 }
0x1a2f   :  { %v2798_v42 = vpop.xlane.xlu0 %2797 }
0x1a30   :  { %3429 = vrcp.f32 %v2798_v42 }
0x1a31   :  { %v2820_v43 = vpop.xlane.xlu1 %2819 }
0x1a32   :  { %3431 = vrcp.f32 %v2820_v43 }
0x1a33   :  { %v2823_v44 = vpop.xlane.xlu0 %2822 }
0x1a34   :  { %3433 = vrcp.f32 %v2823_v44 }
0x1a38   :  { %v3428_v45 = vpop.eup %3427 }
0x1a39   :  { %v2800_v46 = vmul.f32 %v3428_v45, %v3420_v34 }
0x1a3a   :  { %v3430_v47 = vpop.eup %3429 }
0x1a3b   :  { %v2802_v1 = vmul.f32 %v3430_v47, %v3422_v36  ;;  %2803 = vst.msk [vmem:[#allocation2] sm:$0x1] %vm2780_vm10, %v2800_v46 }
0x1a3c   :  { %v3432_v23 = vpop.eup %3431 }
0x1a3d   :  { %2804 = vst.msk [vmem:[#allocation2 + $0x1] sm:$0x1] %vm2780_vm10, %v2802_v1  ;;  %v2825_v2 = vmul.f32 %v3432_v23, %v3424_v37 }
0x1a3e   :  { %v3434_v48 = vpop.eup %3433 }
0x1a3f   :  { %3446 = shalt.err (!%p3443_p4)
}
0x1a40   :  { %s3447_s5 = scalar_lea.hbm %s4121_s24, 32 }
0x1a41   :  { %p3448_p5 = scmp.ne.s32.totalorder %s4121_s24, %s3447_s5  ;;  %p3451_p6 = scmp.lt.u32.totalorder %s3447_s5, %s4121_s24 }
0x1a43   :  { %p3453_p7 = pnand %p3451_p6, %p3448_p5 }
0x1a45   :  { %3456 = shalt.err (!%p3453_p7)
}
0x1a46   :  { %s3493_s18 = smov 1   ;;  %v2827_v49 = vmul.f32 %v3434_v48, %v3426_v39  ;;  %2828 = vst.msk [vmem:[#allocation4] sm:$0x1] %vm2805_vm11, %v2825_v2  ;;  %s3457_s17 = scalar_lea.vmem %s2848_s26, 32 }
0x1a47   :  { %2841 = dma.vmem_to_hbm [thread:$0]  %s2836_s23, 32, %s4121_s24, [#allocation3], %s3489_s30, %s3489_s30, %s3493_s18  }
0x1a48   :  { %2829 = vst.msk [vmem:[#allocation4 + $0x1] sm:$0x1] %vm2805_vm11, %v2827_v49  ;;  %p3458_p8 = scmp.ne.s32.totalorder %s2848_s26, %s3457_s17  ;;  %p3462_p9 = scmp.lt.s32.totalorder %s2848_s26, %s2848_s26 }
0x1a49   :  { %p3463_p10 = scmp.lt.s32.totalorder %s3457_s17, %s3457_s17 }
0x1a4b   :  { %p3464_p11 = por %p3463_p10, %p3462_p9 }
0x1a4d   :  { %p3465_p12 = pnand %p3464_p11, %p3458_p8 }
0x1a4f   :  { %3468 = shalt.err (!%p3465_p12)
}
0x1a50   :  { %s3469_s8 = scalar_lea.hbm %s4122_s25, 32 }
0x1a51   :  { %p3470_p13 = scmp.ne.s32.totalorder %s4122_s25, %s3469_s8  ;;  %p3473_p0 = scmp.lt.u32.totalorder %s3469_s8, %s4122_s25 }
0x1a53   :  { %p3475_p1 = pnand %p3473_p0, %p3470_p13 }
0x1a55   :  { %3478 = shalt.err (!%p3475_p1)
}
0x1a56   :  { %2853 = dma.vmem_to_hbm [thread:$0]  %s2848_s26, 32, %s4122_s25, [#allocation5], %s3489_s30, %s3489_s30, %s3493_s18  }
0x1a57   :  { %3479 = dma.done.wait [#allocation3], 32  }
0x1a58   :  { %3480 = vsyncadd [#allocation3], 4294967264 }
0x1a59   :  { %3481 = dma.done.wait [#allocation5], 32  }
0x1a5a   :  { %3482 = vsyncadd [#allocation5], 4294967264 }
0x1a5b   :  { %2860 = vsyncpa [#allocation3], 1 }
0x1a5c   :  { %2861 = vsyncpa [#allocation5], 1 }

</bundles_post_ra>
